<compile_context>
chip_gen: v7x
topology: tpu7x:2x2x1
jax: 0.10.0
libtpu: 0.0.40
codegen_flags: <defaults>
</compile_context>

<pallas_src>
import jax
import jax.numpy as jnp
from jax.experimental import pallas as pl
from jax.experimental.pallas import tpu as pltpu

# ----------------------------------------------------------------------------
# Model dimensions (small test size, consistent with CriticNetwork constructor)
# ----------------------------------------------------------------------------
BATCH = 256            # example batch (gives a 2-step parallel grid)
STATE_DIM = 8          # input_dims[0]
N_ACTIONS = 8          # n_actions
IN_DIM = STATE_DIM + N_ACTIONS
HIDDEN = 128           # fc1_dims .. fc10_dims (small, lane-dense test size)
N_HIDDEN_LAYERS = 10   # fc1 .. fc10
QLANES = 128           # lane-dense output width; column 0 holds q


# ----------------------------------------------------------------------------
# Pallas kernel: full MLP hot path (10 matmuls + biases + ReLUs + q head) per tile
# ----------------------------------------------------------------------------
def critic_mlp_kernel(x_ref, w1_ref, wh_ref, b_ref, wq_ref, bq_ref, out_ref):
    """Everything lives in VMEM.  Matmuls hit the MXU (bf16 in, f32 acc),
    bias-add / ReLU run on the VPU, the q head uses VPU + XLU reduce."""
    bf16 = jnp.bfloat16
    f32 = jnp.float32

    # fc1: single K=16 MXU push (inputs pre-concatenated & bf16 in the wrapper)
    h = (jnp.dot(x_ref[...], w1_ref[...], preferred_element_type=f32)
         + b_ref[pl.ds(0, 1), :])
    h = jnp.maximum(h, 0.0)

    # fc2 .. fc10: uniform [BM,H] x [H,H] layers from the stacked weight tensor
    for i in range(N_HIDDEN_LAYERS - 1):
        h = (jnp.dot(h.astype(bf16), wh_ref[i], preferred_element_type=f32)
             + b_ref[pl.ds(i + 1, 1), :])
        h = jnp.maximum(h, 0.0)

    # q head: elementwise multiply + cross-lane reduce (no padded matmul / extra
    # MXU pass); broadcast so the output store stays lane-dense and unmasked.
    q = jnp.sum(h * wq_ref[...].astype(f32), axis=-1, keepdims=True)      # [BM, 1]
    out_ref[...] = jnp.broadcast_to(q, out_ref.shape) + bq_ref[...]       # [BM, 128]


# ----------------------------------------------------------------------------
# Batch-tile selection: as big as possible, but keep >=2 grid steps (v7x megacore)
# whenever the batch is large enough for both TensorCores to have work.
# ----------------------------------------------------------------------------
def _pick_bm(batch):
    if batch >= 1024:
        return 512
    if batch >= 512:
        return 256
    if batch >= 256:
        return 128
    if batch >= 128:
        return 64      # still >=2 grid steps -> both TCs on v7x
    return max(8, -(-batch // 8) * 8)   # tiny batch: one 8-row-aligned tile


# ----------------------------------------------------------------------------
# Wrapper
# ----------------------------------------------------------------------------
def critic_forward(state, action, packed):
    """state: [B, STATE_DIM], action: [B, N_ACTIONS].  Returns q: [B, 1]."""
    w1, wh, b, wq_row, bq_row = packed
    B = state.shape[0]

    # Concatenate state||action once in the wrapper (tiny) and cast to bf16 so the
    # kernel's first matmul consumes MXU-native inputs with half the input DMA.
    x = jnp.concatenate([state, action], axis=1).astype(jnp.bfloat16)     # [B, 16]

    bm = _pick_bm(B)
    pad = (-B) % bm
    if pad:  # pad batch to a multiple of the batch tile (rows are independent)
        x = jnp.pad(x, ((0, pad), (0, 0)))
    Bp = B + pad

    const2 = lambda i: (0, 0)      # weights: same block every grid step (stay resident)
    const3 = lambda i: (0, 0, 0)

    out = pl.pallas_call(
        critic_mlp_kernel,
        out_shape=jax.ShapeDtypeStruct((Bp, QLANES), jnp.float32),
        grid=(pl.cdiv(Bp, bm),),
        in_specs=[
            pl.BlockSpec((bm, IN_DIM), lambda i: (i, 0)),                     # input tile
            pl.BlockSpec((IN_DIM, HIDDEN), const2),                           # W1 (16,H)
            pl.BlockSpec((N_HIDDEN_LAYERS - 1, HIDDEN, HIDDEN), const3),      # W2..W10
            pl.BlockSpec((N_HIDDEN_LAYERS, HIDDEN), const2),                  # biases
            pl.BlockSpec((1, HIDDEN), const2),                                # q weight row
            pl.BlockSpec((1, QLANES), const2),                                # q bias (lane-bcast)
        ],
        out_specs=pl.BlockSpec((bm, QLANES), lambda i: (i, 0)),
        compiler_params=pltpu.CompilerParams(
            dimension_semantics=("parallel",)),                               # 2x on v7x megacore
    )(x, w1, wh, b, wq_row, bq_row)

    return out[:B, :1]


# ----------------------------------------------------------------------------
# Deterministic parameter init (mimics nn.Linear U(-1/sqrt(fan_in), ...)), then
# pack into the stacked / bf16 layout consumed by the kernel.
# ----------------------------------------------------------------------------
def init_packed_params(key):
    dims = [IN_DIM] + [HIDDEN] * N_HIDDEN_LAYERS + [1]
    ws, bs = [], []
    for i in range(len(dims) - 1):
        fan_in, fan_out = dims[i], dims[i + 1]
        key, kw, kb = jax.random.split(key, 3)
        bound = 1.0 / (fan_in ** 0.5)
        ws.append(jax.random.uniform(kw, (fan_in, fan_out), jnp.float32, -bound, bound))
        bs.append(jax.random.uniform(kb, (fan_out,), jnp.float32, -bound, bound))

    w1 = ws[0].astype(jnp.bfloat16)                                  # (16, H)
    wh = jnp.stack(ws[1:N_HIDDEN_LAYERS]).astype(jnp.bfloat16)       # (9, H, H)
    b = jnp.stack(bs[:N_HIDDEN_LAYERS]).astype(jnp.float32)          # (10, H)
    wq_row = ws[-1].T.astype(jnp.bfloat16)                           # (1, H)  q weight as a row
    bq_row = jnp.full((1, QLANES), bs[-1][0], jnp.float32)           # (1, 128) q bias broadcast
    return (w1, wh, b, wq_row, bq_row)


def reference_forward(state, action, packed):
    """Pure-JAX reference (same bf16 weights / f32 accumulation) for correctness."""
    w1, wh, b, wq_row, bq_row = packed
    bf16, f32 = jnp.bfloat16, jnp.float32
    x = jnp.concatenate([state, action], axis=1).astype(bf16)
    h = jnp.dot(x, w1, preferred_element_type=f32) + b[0:1]
    h = jnp.maximum(h, 0.0)
    for i in range(N_HIDDEN_LAYERS - 1):
        h = jnp.dot(h.astype(bf16), wh[i], preferred_element_type=f32) + b[i + 1:i + 2]
        h = jnp.maximum(h, 0.0)
    q = jnp.sum(h * wq_row.astype(f32), axis=-1, keepdims=True) + bq_row[0, 0]
    return q


if __name__ == "__main__":
    key = jax.random.PRNGKey(0)
    key, ks, ka, kp = jax.random.split(key, 4)

    state = jax.random.normal(ks, (BATCH, STATE_DIM), jnp.float32)
    action = jax.random.normal(ka, (BATCH, N_ACTIONS), jnp.float32)
    params = init_packed_params(kp)

    q = critic_forward(state, action, params)
    q = jax.block_until_ready(q)

    q_ref = reference_forward(state, action, params)
    assert q.shape == (BATCH, 1)
    assert jnp.allclose(q, q_ref, atol=1e-2, rtol=1e-2), "mismatch vs reference"

    # TODO(synk): optimizer (Adam) and checkpoint save/load from the PyTorch module are
    # training/IO concerns, not part of the forward pass, and are not kernelized.
    print("KERNEL_OK")
</pallas_src>

<mosaic_0001>
module attributes {stable_mosaic.version = 11 : i64} {
  func.func @critic_mlp_kernel(%arg0: i32, %arg1: memref<128x16xbf16, #tpu.memory_space<vmem>>, %arg2: memref<16x128xbf16, #tpu.memory_space<vmem>>, %arg3: memref<9x128x128xbf16, #tpu.memory_space<vmem>>, %arg4: memref<10x128xf32, #tpu.memory_space<vmem>>, %arg5: memref<1x128xbf16, #tpu.memory_space<vmem>>, %arg6: memref<1x128xf32, #tpu.memory_space<vmem>>, %arg7: memref<128x128xf32, #tpu.memory_space<vmem>>) attributes {dimension_semantics = [#tpu.dimension_semantics<parallel>], iteration_bounds = array<i64: 2>, scalar_prefetch = 0 : i64, scratch_operands = 0 : i64, tpu.core_type = #tpu.core_type<tc>, window_params = [{transform_indices = @transform_0, window_bounds = array<i64: 128, 16>}, {pipeline_mode = #tpu.pipeline_mode<synchronous>, transform_indices = @transform_1, window_bounds = array<i64: 16, 128>}, {pipeline_mode = #tpu.pipeline_mode<synchronous>, transform_indices = @transform_2, window_bounds = array<i64: 9, 128, 128>}, {pipeline_mode = #tpu.pipeline_mode<synchronous>, transform_indices = @transform_3, window_bounds = array<i64: 10, 128>}, {pipeline_mode = #tpu.pipeline_mode<synchronous>, transform_indices = @transform_4, window_bounds = array<i64: 1, 128>}, {pipeline_mode = #tpu.pipeline_mode<synchronous>, transform_indices = @transform_5, window_bounds = array<i64: 1, 128>}, {transform_indices = @transform_6, window_bounds = array<i64: 128, 128>}]} {
    %c0 = arith.constant 0 : index
    %c0_0 = arith.constant 0 : index
    %0 = vector.load %arg1[%c0, %c0_0] : memref<128x16xbf16, #tpu.memory_space<vmem>>, vector<128x16xbf16>
    %c0_1 = arith.constant 0 : index
    %c0_2 = arith.constant 0 : index
    %1 = vector.load %arg2[%c0_1, %c0_2] : memref<16x128xbf16, #tpu.memory_space<vmem>>, vector<16x128xbf16>
    %cst = arith.constant dense<0.000000e+00> : vector<128x128xf32>
    %2 = tpu.matmul %0, %1, %cst {dimension_numbers = #tpu.dot_dimension_numbers<[1], [0], [0], [1], [0, 0, 1, 1], [], []>} : vector<128x16xbf16>, vector<16x128xbf16>, vector<128x128xf32> -> vector<128x128xf32>
    %c0_3 = arith.constant 0 : index
    %c0_4 = arith.constant 0 : index
    %3 = vector.load %arg4[%c0_3, %c0_4] : memref<10x128xf32, #tpu.memory_space<vmem>>, vector<1x128xf32>
    %4 = vector.broadcast %3 : vector<1x128xf32> to vector<128x128xf32>
    %5 = arith.addf %2, %4 : vector<128x128xf32>
    %cst_5 = arith.constant 0.000000e+00 : f32
    %6 = vector.broadcast %cst_5 : f32 to vector<128x128xf32>
    %7 = arith.maximumf %5, %6 : vector<128x128xf32>
    %8 = arith.truncf %7 : vector<128x128xf32> to vector<128x128xbf16>
    %c0_6 = arith.constant 0 : index
    %c0_7 = arith.constant 0 : index
    %c0_8 = arith.constant 0 : index
    %9 = vector.load %arg3[%c0_6, %c0_7, %c0_8] : memref<9x128x128xbf16, #tpu.memory_space<vmem>>, vector<1x128x128xbf16>
    %10 = vector.shape_cast %9 : vector<1x128x128xbf16> to vector<128x128xbf16>
    %cst_9 = arith.constant dense<0.000000e+00> : vector<128x128xf32>
    %11 = tpu.matmul %8, %10, %cst_9 {dimension_numbers = #tpu.dot_dimension_numbers<[1], [0], [0], [1], [0, 0, 1, 1], [], []>} : vector<128x128xbf16>, vector<128x128xbf16>, vector<128x128xf32> -> vector<128x128xf32>
    %c1 = arith.constant 1 : index
    %c0_10 = arith.constant 0 : index
    %12 = vector.load %arg4[%c1, %c0_10] : memref<10x128xf32, #tpu.memory_space<vmem>>, vector<1x128xf32>
    %13 = vector.broadcast %12 : vector<1x128xf32> to vector<128x128xf32>
    %14 = arith.addf %11, %13 : vector<128x128xf32>
    %cst_11 = arith.constant 0.000000e+00 : f32
    %15 = vector.broadcast %cst_11 : f32 to vector<128x128xf32>
    %16 = arith.maximumf %14, %15 : vector<128x128xf32>
    %17 = arith.truncf %16 : vector<128x128xf32> to vector<128x128xbf16>
    %c1_12 = arith.constant 1 : index
    %c0_13 = arith.constant 0 : index
    %c0_14 = arith.constant 0 : index
    %18 = vector.load %arg3[%c1_12, %c0_13, %c0_14] : memref<9x128x128xbf16, #tpu.memory_space<vmem>>, vector<1x128x128xbf16>
    %19 = vector.shape_cast %18 : vector<1x128x128xbf16> to vector<128x128xbf16>
    %cst_15 = arith.constant dense<0.000000e+00> : vector<128x128xf32>
    %20 = tpu.matmul %17, %19, %cst_15 {dimension_numbers = #tpu.dot_dimension_numbers<[1], [0], [0], [1], [0, 0, 1, 1], [], []>} : vector<128x128xbf16>, vector<128x128xbf16>, vector<128x128xf32> -> vector<128x128xf32>
    %c2 = arith.constant 2 : index
    %c0_16 = arith.constant 0 : index
    %21 = vector.load %arg4[%c2, %c0_16] : memref<10x128xf32, #tpu.memory_space<vmem>>, vector<1x128xf32>
    %22 = vector.broadcast %21 : vector<1x128xf32> to vector<128x128xf32>
    %23 = arith.addf %20, %22 : vector<128x128xf32>
    %cst_17 = arith.constant 0.000000e+00 : f32
    %24 = vector.broadcast %cst_17 : f32 to vector<128x128xf32>
    %25 = arith.maximumf %23, %24 : vector<128x128xf32>
    %26 = arith.truncf %25 : vector<128x128xf32> to vector<128x128xbf16>
    %c2_18 = arith.constant 2 : index
    %c0_19 = arith.constant 0 : index
    %c0_20 = arith.constant 0 : index
    %27 = vector.load %arg3[%c2_18, %c0_19, %c0_20] : memref<9x128x128xbf16, #tpu.memory_space<vmem>>, vector<1x128x128xbf16>
    %28 = vector.shape_cast %27 : vector<1x128x128xbf16> to vector<128x128xbf16>
    %cst_21 = arith.constant dense<0.000000e+00> : vector<128x128xf32>
    %29 = tpu.matmul %26, %28, %cst_21 {dimension_numbers = #tpu.dot_dimension_numbers<[1], [0], [0], [1], [0, 0, 1, 1], [], []>} : vector<128x128xbf16>, vector<128x128xbf16>, vector<128x128xf32> -> vector<128x128xf32>
    %c3 = arith.constant 3 : index
    %c0_22 = arith.constant 0 : index
    %30 = vector.load %arg4[%c3, %c0_22] : memref<10x128xf32, #tpu.memory_space<vmem>>, vector<1x128xf32>
    %31 = vector.broadcast %30 : vector<1x128xf32> to vector<128x128xf32>
    %32 = arith.addf %29, %31 : vector<128x128xf32>
    %cst_23 = arith.constant 0.000000e+00 : f32
    %33 = vector.broadcast %cst_23 : f32 to vector<128x128xf32>
    %34 = arith.maximumf %32, %33 : vector<128x128xf32>
    %35 = arith.truncf %34 : vector<128x128xf32> to vector<128x128xbf16>
    %c3_24 = arith.constant 3 : index
    %c0_25 = arith.constant 0 : index
    %c0_26 = arith.constant 0 : index
    %36 = vector.load %arg3[%c3_24, %c0_25, %c0_26] : memref<9x128x128xbf16, #tpu.memory_space<vmem>>, vector<1x128x128xbf16>
    %37 = vector.shape_cast %36 : vector<1x128x128xbf16> to vector<128x128xbf16>
    %cst_27 = arith.constant dense<0.000000e+00> : vector<128x128xf32>
    %38 = tpu.matmul %35, %37, %cst_27 {dimension_numbers = #tpu.dot_dimension_numbers<[1], [0], [0], [1], [0, 0, 1, 1], [], []>} : vector<128x128xbf16>, vector<128x128xbf16>, vector<128x128xf32> -> vector<128x128xf32>
    %c4 = arith.constant 4 : index
    %c0_28 = arith.constant 0 : index
    %39 = vector.load %arg4[%c4, %c0_28] : memref<10x128xf32, #tpu.memory_space<vmem>>, vector<1x128xf32>
    %40 = vector.broadcast %39 : vector<1x128xf32> to vector<128x128xf32>
    %41 = arith.addf %38, %40 : vector<128x128xf32>
    %cst_29 = arith.constant 0.000000e+00 : f32
    %42 = vector.broadcast %cst_29 : f32 to vector<128x128xf32>
    %43 = arith.maximumf %41, %42 : vector<128x128xf32>
    %44 = arith.truncf %43 : vector<128x128xf32> to vector<128x128xbf16>
    %c4_30 = arith.constant 4 : index
    %c0_31 = arith.constant 0 : index
    %c0_32 = arith.constant 0 : index
    %45 = vector.load %arg3[%c4_30, %c0_31, %c0_32] : memref<9x128x128xbf16, #tpu.memory_space<vmem>>, vector<1x128x128xbf16>
    %46 = vector.shape_cast %45 : vector<1x128x128xbf16> to vector<128x128xbf16>
    %cst_33 = arith.constant dense<0.000000e+00> : vector<128x128xf32>
    %47 = tpu.matmul %44, %46, %cst_33 {dimension_numbers = #tpu.dot_dimension_numbers<[1], [0], [0], [1], [0, 0, 1, 1], [], []>} : vector<128x128xbf16>, vector<128x128xbf16>, vector<128x128xf32> -> vector<128x128xf32>
    %c5 = arith.constant 5 : index
    %c0_34 = arith.constant 0 : index
    %48 = vector.load %arg4[%c5, %c0_34] : memref<10x128xf32, #tpu.memory_space<vmem>>, vector<1x128xf32>
    %49 = vector.broadcast %48 : vector<1x128xf32> to vector<128x128xf32>
    %50 = arith.addf %47, %49 : vector<128x128xf32>
    %cst_35 = arith.constant 0.000000e+00 : f32
    %51 = vector.broadcast %cst_35 : f32 to vector<128x128xf32>
    %52 = arith.maximumf %50, %51 : vector<128x128xf32>
    %53 = arith.truncf %52 : vector<128x128xf32> to vector<128x128xbf16>
    %c5_36 = arith.constant 5 : index
    %c0_37 = arith.constant 0 : index
    %c0_38 = arith.constant 0 : index
    %54 = vector.load %arg3[%c5_36, %c0_37, %c0_38] : memref<9x128x128xbf16, #tpu.memory_space<vmem>>, vector<1x128x128xbf16>
    %55 = vector.shape_cast %54 : vector<1x128x128xbf16> to vector<128x128xbf16>
    %cst_39 = arith.constant dense<0.000000e+00> : vector<128x128xf32>
    %56 = tpu.matmul %53, %55, %cst_39 {dimension_numbers = #tpu.dot_dimension_numbers<[1], [0], [0], [1], [0, 0, 1, 1], [], []>} : vector<128x128xbf16>, vector<128x128xbf16>, vector<128x128xf32> -> vector<128x128xf32>
    %c6 = arith.constant 6 : index
    %c0_40 = arith.constant 0 : index
    %57 = vector.load %arg4[%c6, %c0_40] : memref<10x128xf32, #tpu.memory_space<vmem>>, vector<1x128xf32>
    %58 = vector.broadcast %57 : vector<1x128xf32> to vector<128x128xf32>
    %59 = arith.addf %56, %58 : vector<128x128xf32>
    %cst_41 = arith.constant 0.000000e+00 : f32
    %60 = vector.broadcast %cst_41 : f32 to vector<128x128xf32>
    %61 = arith.maximumf %59, %60 : vector<128x128xf32>
    %62 = arith.truncf %61 : vector<128x128xf32> to vector<128x128xbf16>
    %c6_42 = arith.constant 6 : index
    %c0_43 = arith.constant 0 : index
    %c0_44 = arith.constant 0 : index
    %63 = vector.load %arg3[%c6_42, %c0_43, %c0_44] : memref<9x128x128xbf16, #tpu.memory_space<vmem>>, vector<1x128x128xbf16>
    %64 = vector.shape_cast %63 : vector<1x128x128xbf16> to vector<128x128xbf16>
    %cst_45 = arith.constant dense<0.000000e+00> : vector<128x128xf32>
    %65 = tpu.matmul %62, %64, %cst_45 {dimension_numbers = #tpu.dot_dimension_numbers<[1], [0], [0], [1], [0, 0, 1, 1], [], []>} : vector<128x128xbf16>, vector<128x128xbf16>, vector<128x128xf32> -> vector<128x128xf32>
    %c7 = arith.constant 7 : index
    %c0_46 = arith.constant 0 : index
    %66 = vector.load %arg4[%c7, %c0_46] : memref<10x128xf32, #tpu.memory_space<vmem>>, vector<1x128xf32>
    %67 = vector.broadcast %66 : vector<1x128xf32> to vector<128x128xf32>
    %68 = arith.addf %65, %67 : vector<128x128xf32>
    %cst_47 = arith.constant 0.000000e+00 : f32
    %69 = vector.broadcast %cst_47 : f32 to vector<128x128xf32>
    %70 = arith.maximumf %68, %69 : vector<128x128xf32>
    %71 = arith.truncf %70 : vector<128x128xf32> to vector<128x128xbf16>
    %c7_48 = arith.constant 7 : index
    %c0_49 = arith.constant 0 : index
    %c0_50 = arith.constant 0 : index
    %72 = vector.load %arg3[%c7_48, %c0_49, %c0_50] : memref<9x128x128xbf16, #tpu.memory_space<vmem>>, vector<1x128x128xbf16>
    %73 = vector.shape_cast %72 : vector<1x128x128xbf16> to vector<128x128xbf16>
    %cst_51 = arith.constant dense<0.000000e+00> : vector<128x128xf32>
    %74 = tpu.matmul %71, %73, %cst_51 {dimension_numbers = #tpu.dot_dimension_numbers<[1], [0], [0], [1], [0, 0, 1, 1], [], []>} : vector<128x128xbf16>, vector<128x128xbf16>, vector<128x128xf32> -> vector<128x128xf32>
    %c8 = arith.constant 8 : index
    %c0_52 = arith.constant 0 : index
    %75 = vector.load %arg4[%c8, %c0_52] : memref<10x128xf32, #tpu.memory_space<vmem>>, vector<1x128xf32>
    %76 = vector.broadcast %75 : vector<1x128xf32> to vector<128x128xf32>
    %77 = arith.addf %74, %76 : vector<128x128xf32>
    %cst_53 = arith.constant 0.000000e+00 : f32
    %78 = vector.broadcast %cst_53 : f32 to vector<128x128xf32>
    %79 = arith.maximumf %77, %78 : vector<128x128xf32>
    %80 = arith.truncf %79 : vector<128x128xf32> to vector<128x128xbf16>
    %c8_54 = arith.constant 8 : index
    %c0_55 = arith.constant 0 : index
    %c0_56 = arith.constant 0 : index
    %81 = vector.load %arg3[%c8_54, %c0_55, %c0_56] : memref<9x128x128xbf16, #tpu.memory_space<vmem>>, vector<1x128x128xbf16>
    %82 = vector.shape_cast %81 : vector<1x128x128xbf16> to vector<128x128xbf16>
    %cst_57 = arith.constant dense<0.000000e+00> : vector<128x128xf32>
    %83 = tpu.matmul %80, %82, %cst_57 {dimension_numbers = #tpu.dot_dimension_numbers<[1], [0], [0], [1], [0, 0, 1, 1], [], []>} : vector<128x128xbf16>, vector<128x128xbf16>, vector<128x128xf32> -> vector<128x128xf32>
    %c9 = arith.constant 9 : index
    %c0_58 = arith.constant 0 : index
    %84 = vector.load %arg4[%c9, %c0_58] : memref<10x128xf32, #tpu.memory_space<vmem>>, vector<1x128xf32>
    %85 = vector.broadcast %84 : vector<1x128xf32> to vector<128x128xf32>
    %86 = arith.addf %83, %85 : vector<128x128xf32>
    %cst_59 = arith.constant 0.000000e+00 : f32
    %87 = vector.broadcast %cst_59 : f32 to vector<128x128xf32>
    %88 = arith.maximumf %86, %87 : vector<128x128xf32>
    %c0_60 = arith.constant 0 : index
    %c0_61 = arith.constant 0 : index
    %89 = vector.load %arg5[%c0_60, %c0_61] : memref<1x128xbf16, #tpu.memory_space<vmem>>, vector<1x128xbf16>
    %90 = arith.extf %89 : vector<1x128xbf16> to vector<1x128xf32>
    %91 = vector.broadcast %90 : vector<1x128xf32> to vector<128x128xf32>
    %92 = arith.mulf %88, %91 : vector<128x128xf32>
    %cst_62 = arith.constant dense<0.000000e+00> : vector<128xf32>
    %93 = vector.multi_reduction <add>, %92, %cst_62 [1] : vector<128x128xf32> to vector<128xf32>
    %94 = vector.shape_cast %93 : vector<128xf32> to vector<128x1xf32>
    %95 = vector.shape_cast %94 : vector<128x1xf32> to vector<128x1xf32>
    %96 = vector.broadcast %95 : vector<128x1xf32> to vector<128x128xf32>
    %c0_63 = arith.constant 0 : index
    %c0_64 = arith.constant 0 : index
    %97 = vector.load %arg6[%c0_63, %c0_64] : memref<1x128xf32, #tpu.memory_space<vmem>>, vector<1x128xf32>
    %98 = vector.broadcast %97 : vector<1x128xf32> to vector<128x128xf32>
    %99 = arith.addf %96, %98 : vector<128x128xf32>
    %c0_65 = arith.constant 0 : index
    %c0_66 = arith.constant 0 : index
    %100 = vector.load %arg7[%c0_65, %c0_66] : memref<128x128xf32, #tpu.memory_space<vmem>>, vector<128x128xf32>
    tpu.vector_store %arg7[%c0_65, %c0_66], %99 {strides = array<i32>} : memref<128x128xf32, #tpu.memory_space<vmem>>, vector<128x128xf32>,
    return
  }
  func.func @transform_0(%arg0: i32) -> (i32, i32) {
    %c0_i32 = arith.constant 0 : i32
    %c0_i32_0 = arith.constant 0 : i32
    return %arg0, %c0_i32 : i32, i32
  }
  func.func @transform_1(%arg0: i32) -> (i32, i32) {
    %c0_i32 = arith.constant 0 : i32
    %c0_i32_0 = arith.constant 0 : i32
    %c0_i32_1 = arith.constant 0 : i32
    return %c0_i32, %c0_i32_0 : i32, i32
  }
  func.func @transform_2(%arg0: i32) -> (i32, i32, i32) {
    %c0_i32 = arith.constant 0 : i32
    %c0_i32_0 = arith.constant 0 : i32
    %c0_i32_1 = arith.constant 0 : i32
    %c0_i32_2 = arith.constant 0 : i32
    return %c0_i32, %c0_i32_0, %c0_i32_1 : i32, i32, i32
  }
  func.func @transform_3(%arg0: i32) -> (i32, i32) {
    %c0_i32 = arith.constant 0 : i32
    %c0_i32_0 = arith.constant 0 : i32
    %c0_i32_1 = arith.constant 0 : i32
    return %c0_i32, %c0_i32_0 : i32, i32
  }
  func.func @transform_4(%arg0: i32) -> (i32, i32) {
    %c0_i32 = arith.constant 0 : i32
    %c0_i32_0 = arith.constant 0 : i32
    %c0_i32_1 = arith.constant 0 : i32
    return %c0_i32, %c0_i32_0 : i32, i32
  }
  func.func @transform_5(%arg0: i32) -> (i32, i32) {
    %c0_i32 = arith.constant 0 : i32
    %c0_i32_0 = arith.constant 0 : i32
    %c0_i32_1 = arith.constant 0 : i32
    return %c0_i32, %c0_i32_0 : i32, i32
  }
  func.func @transform_6(%arg0: i32) -> (i32, i32) {
    %c0_i32 = arith.constant 0 : i32
    %c0_i32_0 = arith.constant 0 : i32
    return %arg0, %c0_i32 : i32, i32
  }
}

</mosaic_0001>

<bundles_post_ra>
// kernel: tpu_custom_call.1
= control target key start
LH: loop header
LB: loop body
LE: loop exit
PB: predicated region body
PF: predicated region fallthrough
CT: control target
= control target key end

     0   :  { %11 = vsyncpa [#allocation3], 0  ;;  %s3526_s0 = inlined_call_operand.vmem [shape: bf16[256,16], index: 0, kind: input, shape index: {}]   ;;  %s3527_s1 = inlined_call_operand.vmem [shape: bf16[16,128], index: 1, kind: input, shape index: {}]   ;;  %s3528_s2 = inlined_call_operand.hbm [shape: bf16[9,128,128], index: 2, kind: input, shape index: {}]   ;;  %s3529_s3 = inlined_call_operand.vmem [shape: f32[10,128], index: 3, kind: input, shape index: {}]   ;;  %s3530_s4 = inlined_call_operand.vmem [shape: bf16[1,128], index: 4, kind: input, shape index: {}]   ;;  %s3531_s5 = inlined_call_operand.vmem [shape: f32[1,128], index: 5, kind: input, shape index: {}]   ;;  %s3532_s6 = inlined_call_operand.hbm [shape: f32[256,128], index: 6, kind: output, shape index: {}]  }
   0x1   :  { %12 = vsyncpa [#allocation4], 0 }
   0x2   :  { %14 = vsyncpa [#allocation4 + $0x1], 0  ;;  %s3237_s21 = smov 0   ;;  %s3239_s22 = smov 0  }
   0x3   :  { %s3241_s23 = smov 0   ;;  %s3243_s24 = smov 0  }
   0x4 LB: > { %s3258_s25 = sadd.s32 4294967295, %s3194_s24   ;;  %s2375_s26 = sadd.s32 4294967294, %s3194_s24   ;;  %s3194_s24 = sphi %s3243_s24, %s3548_s24   ;;  %s3190_s23 = sphi %s3241_s23, %s3547_s23   ;;  %s3186_s22 = sphi %s3239_s22, %s3546_s22   ;;  %s3182_s21 = sphi %s3237_s21, %s3545_s21  }
   0x5   : > { %s3262_s27 = sadd.s32 1, %s3194_s24   ;;  %s158_s28 = sadd.s32 1, %s3190_s23 }
   0x6   : > { %s155_s29 = ssub.s32 %s3194_s24, %s3262_s27  ;;  %p168_p0 = scmp.ne.s32.totalorder %s3190_s23, %s3186_s22 }
   0x7   : > { %p156_p1 = scmp.eq.s32.totalorder %s155_s29, 0  ;;  %p169_p2 = scmp.eq.s32.totalorder %s3258_s25, 1 }
   0x8   : > { %p174_p3 = scmp.ne.s32.totalorder %s3186_s22, %s3182_s21  ;;  %p175_p4 = scmp.eq.s32.totalorder %s2375_s26, 1 }
   0x9   : > { %s3273_s30 = scalar_select %p156_p1, %s3190_s23, %s158_s28  }
   0xa   : > { %p3275_p5 = por %p169_p2, %p168_p0  ;;  %p3279_p6 = por %p175_p4, %p174_p3 }
   0xb   : > { %p2376_p7 = scmp.ge.s32.totalorder %s3194_s24, 1  ;;  %p182_p8 = scmp.lt.s32.totalorder %s3194_s24, 3 }
   0xc   : > { %s3536_s7 = scalar_select %p3275_p5, 1, 0 }
   0xd   : > { %s3537_s8 = scalar_select %p3279_p6, 1, 0 }
   0xe   : > { %p3533_p9 = scmp.eq.s32.totalorder %s3258_s25, 0  ;;  %p3286_p10 = pnand %p2376_p7, %p182_p8 }
   0xf   : > { %s3196_s10 = smov [#allocation2]   ;;  %s3100_s15 = scalar_lea.hbm %s3528_s2, 9216 }
  0x10   : > { %s3538_s9 = scalar_select %p3286_p10, 1, 0 }
  0x11   : > { %s197_s11 = sshll.u32 %s3196_s10, 4  ;;  %p2971_p11 = pneg %p3286_p10  ;;  %s198_s11 = int_to_ptr.vmem [resolvable:$true] %s197_s11 }
  0x12   : > { %p3101_p13 = scmp.ne.s32.totalorder %s3528_s2, %s3100_s15  ;;  %p3107_p3 = scmp.lt.u32.totalorder %s3100_s15, %s3528_s2 }
  0x13   : > { %p3294_p12 = pnand %p3533_p9, %p2971_p11 }
  0x15   : > { %p3102_p0 = pneg %p3294_p12 }
  0x17   : > { %p3103_p1 = pnand %p3102_p0, %p3101_p13 }
  0x19   : > { %p3104_p2 = pneg %p3103_p1 }
  0x1b   : > { %p3109_p4 = pnand %p3107_p3, %p3104_p2 }
  0x1d   : > { %3112 = shalt.err (!%p3109_p4)
}
  0x1e   : > { %s3113_s20 = scalar_lea.vmem %s198_s11, 9216  ;;  %p3121_p9 = scmp.lt.s32.totalorder %s198_s11, %s198_s11 }
  0x1f   : > { %p3114_p7 = scmp.ne.s32.totalorder %s198_s11, %s3113_s20  ;;  %p3122_p6 = scmp.lt.s32.totalorder %s3113_s20, %s3113_s20 }
  0x21   : > { %p3116_p8 = pnand %p3114_p7, %p3102_p0  ;;  %p3123_p5 = por %p3122_p6, %p3121_p9 }
  0x23   : > { %p3117_p11 = pneg %p3116_p8 }
  0x25   : > { %p3124_p10 = pnand %p3123_p5, %p3117_p11 }
  0x27   : > { %3127 = shalt.err (!%p3124_p10)
}
  0x28   : > { %s3197_s26 = smov 64   ;;  %s3198_s28 = smov 4  }
  0x29   : > { %2974 = dma.hbm_to_vmem [thread:$0]  (!%p3294_p12), %s3528_s2, 9216, %s198_s11, [#allocation3], %s3197_s26, %s3197_s26, %s3198_s28  }
  0x2a   : > { %p3540_p13 = scmp.ne.s32.totalorder %s3538_s9, 0 }
  0x2b   : > { %p3541_p1 = scmp.eq.s32.totalorder (!%p3540_p13), %s3258_s25, 0 }
  0x2c   : > { %231 = sbr.rel (%p3540_p13) target bundleno = 2466 (0x9a2), region = 44 }
  0x33   : > { %3173 = dma.done.wait (%p3541_p1), [#allocation3], 9216   ;;  %p3542_p0 = pmov %p3541_p1 }
  0x34   : > { %s2382_s13 = sshll.u32 %s3258_s25, 4  ;;  %v3019_v0 = vld [vmem:[%s3527_s1] sm:$0xff]   ;;  %vm338_vm0 = vcmask 130048   ;;  %v3029_v6 = vld [vmem:[#allocation2 + $0x8] sm:$0xff]   ;;  %v3030_v8 = vld [vmem:[#allocation2 + $0x10] sm:$0xff]   ;;  %s258_s10 = sand.u32 1, %s3186_s22  }
  0x35   : > { %3175 = vsyncadd (%p3542_p0), [#allocation3], 4294958080  ;;  %p262_p5 = scmp.lt.s32.totalorder %s2382_s13, 31  ;;  %2643 = vmatprep.subr.bf16.mxu0 %v3019_v0  ;;  %v3028_v5 = vld [vmem:[#allocation2] sm:$0xff]   ;;  %v3031_v9 = vld [vmem:[#allocation2 + $0x18] sm:$0xff]   ;;  %p3543_p9 = scmp.ne.s32.totalorder %s3536_s7, 0 }
  0x36   : > { %2644 = vmatpush3.bf16.msra.mxu0 %v3019_v0  ;;  %2661 = vmatprep.subr.bf16.mxu1 %v3028_v5  ;;  %v3032_v12 = vld [vmem:[#allocation2 + $0x20] sm:$0xff]   ;;  %v3033_v13 = vld [vmem:[#allocation2 + $0x28] sm:$0xff]   ;;  %v3034_v15 = vld [vmem:[#allocation2 + $0x30] sm:$0xff]   ;;  %s3199_s20 = smov [#allocation5]  }
  0x37   : > { %s3550_s13 = smov (!%p262_p5, %s2382_s13), 31  ;;  %2662 = vmatpush3.bf16.msra.mxu1 %v3028_v5  ;;  %v3035_v16 = vld [vmem:[#allocation2 + $0x38] sm:$0xff]   ;;  %v3036_v17 = vld [vmem:[#allocation2 + $0x40] sm:$0xff]   ;;  %v3037_v18 = vld [vmem:[#allocation2 + $0x48] sm:$0xff]   ;;  %s3132_s26 = sshll.u32 %s3199_s20, 4  ;;  %s3133_s26 = int_to_ptr.vmem [resolvable:$false] %s3132_s26 }
  0x38   : > { %s2383_s14 = sshll.u32 %s3550_s13, 2  ;;  %2663 = vmatprep.subr.bf16.mxu1 %v3029_v6  ;;  %2693 = vmatprep.subr.bf16.mxu0 %v3036_v17  ;;  %v3038_v19 = vld [vmem:[#allocation2 + $0x50] sm:$0xff]   ;;  %v3039_v20 = vld [vmem:[#allocation2 + $0x58] sm:$0xff]   ;;  %v3040_v21 = vld [vmem:[#allocation2 + $0x60] sm:$0xff]   ;;  %s2381_s13 = sshll.u32 %s258_s10, 7 }
  0x39   : > { %s3324_s16 = scalar_lea.vmem %s3526_s0, %s2383_s14  ;;  %v3041_v22 = vld [vmem:[#allocation2 + $0x68] sm:$0xff]   ;;  %v2384_v23 = vld [vmem:[%s3529_s3] ss:$0 sm:$0xff]  ;;  %s3456_s12 = scalar_lea.vmem [#allocation5], %s2381_s13 }
  0x3a   : > { %v3020_v1 = vld [vmem:[%s3324_s16] sm:$0xff]   ;;  %v3021_v2 = vld [vmem:[%s3324_s16 + $0x8] sm:$0xff]   ;;  %v3022_v3 = vld [vmem:[%s3324_s16 + $0x10] sm:$0xff]   ;;  %s2301_s11 = sshll.u32 %s3456_s12, 4  ;;  %s3134_s28 = scalar_lea.vmem %s3133_s26, 4096  ;;  %s3479_s11 = int_to_ptr.vmem [resolvable:$true] %s2301_s11 }
  0x3b   : > { %2645 = vmatprep.mubr.msk.bf16.mxu0 %vm338_vm0, %v3020_v1  ;;  %v3023_v4 = vld [vmem:[%s3324_s16 + $0x18] sm:$0xff]   ;;  %v3024_v7 = vld [vmem:[%s3324_s16 + $0x20] sm:$0xff]   ;;  %v3025_v10 = vld [vmem:[%s3324_s16 + $0x28] sm:$0xff]   ;;  %2664 = vmatpush3.bf16.msra.mxu1 %v3029_v6  ;;  %s3128_s19 = scalar_lea.vmem %s3479_s11, 2048  ;;  %p3135_p2 = scmp.lt.s32.totalorder %s3479_s11, %s3133_s26 }
  0x3c   : > { %2646 = vmatmul.mubr.msk.bf16.vlgmr.msra.gmra.mrb[0].mxu0 %vm338_vm0, %v3021_v2  ;;  %v3026_v11 = vld [vmem:[%s3324_s16 + $0x30] sm:$0xff]   ;;  %2665 = vmatprep.subr.bf16.mxu1 %v3030_v8  ;;  %v3027_v14 = vld [vmem:[%s3324_s16 + $0x38] sm:$0xff]   ;;  %s2489_s16 = sshll.u32 %s3258_s25, 11  ;;  %s3485_s25 = scalar_lea.sflag [#allocation4], %s258_s10 }
  0x3d   : > { %2649 = vmatprep.mubr.msk.bf16.mxu0 %vm338_vm0, %v3022_v3  ;;  %2694 = vmatpush3.bf16.msra.mxu0 %v3036_v17  ;;  %v3043_v17 = vld [vmem:[#allocation2 + $0x78] sm:$0xff]   ;;  %s3477_s18 = scalar_lea.hbm %s3532_s6, %s2489_s16  ;;  %p3129_p6 = scmp.ne.s32.totalorder %s3479_s11, %s3128_s19 }
  0x3e   : > { %2695 = vmatprep.subr.bf16.mxu0 %v3037_v18  ;;  %p3136_p3 = scmp.lt.s32.totalorder %s3134_s28, %s3128_s19 }
  0x3f   : > { %2666 = vmatpush3.bf16.msra.mxu1 %v3030_v8  ;;  %p3130_p10 = pnand %p3129_p6, %p3543_p9 }
  0x40   : > { %2667 = vmatprep.subr.bf16.mxu1 %v3031_v9  ;;  %p3137_p4 = por %p3136_p3, %p3135_p2 }
  0x41   : > { %2696 = vmatpush3.bf16.msra.mxu0 %v3037_v18  ;;  %v3044_v18 = vld [vmem:[#allocation2 + $0x80] sm:$0xff]   ;;  %p3131_p12 = pneg %p3130_p10 }
  0x42   : > { %2697 = vmatprep.subr.bf16.mxu0 %v3038_v19 }
  0x43   : > { %2668 = vmatpush3.bf16.msra.mxu1 %v3031_v9  ;;  %p3138_p7 = pnand %p3137_p4, %p3131_p12 }
  0x44   : > { %2650 = vmatmul.mubr.msk.bf16.gmra.mrb[4].mxu0 %vm338_vm0, %v3023_v4  ;;  %2669 = vmatprep.subr.bf16.mxu1 %v3032_v12 }
  0x45   : > { %2653 = vmatprep.mubr.msk.bf16.mxu0 %vm338_vm0, %v3024_v7  ;;  %2698 = vmatpush3.bf16.msra.mxu0 %v3038_v19  ;;  %v3045_v19 = vld [vmem:[#allocation2 + $0x88] sm:$0xff]  }
  0x46   : > { %2699 = vmatprep.subr.bf16.mxu0 %v3039_v20 }
  0x47   : > { %2670 = vmatpush3.bf16.msra.mxu1 %v3032_v12 }
  0x48   : > { %2671 = vmatprep.subr.bf16.mxu1 %v3033_v13 }
  0x49   : > { %2700 = vmatpush3.bf16.msra.mxu0 %v3039_v20  ;;  %v3046_v20 = vld [vmem:[#allocation2 + $0x90] sm:$0xff]  }
  0x4a   : > { %2701 = vmatprep.subr.bf16.mxu0 %v3040_v21 }
  0x4b   : > { %2672 = vmatpush3.bf16.msra.mxu1 %v3033_v13 }
  0x4c   : > { %2654 = vmatmul.mubr.msk.bf16.gmra.mrb[8].mxu0 %vm338_vm0, %v3025_v10  ;;  %2673 = vmatprep.subr.bf16.mxu1 %v3034_v15 }
  0x4d   : > { %2657 = vmatprep.mubr.msk.bf16.mxu0 %vm338_vm0, %v3026_v11  ;;  %2702 = vmatpush3.bf16.msra.mxu0 %v3040_v21  ;;  %v3047_v21 = vld [vmem:[#allocation2 + $0x98] sm:$0xff]  }
  0x4e   : > { %2703 = vmatprep.subr.bf16.mxu0 %v3041_v22 }
  0x4f   : > { %2674 = vmatpush3.bf16.msra.mxu1 %v3034_v15 }
  0x50   : > { %2675 = vmatprep.subr.bf16.mxu1 %v3035_v16 }
  0x51   : > { %2704 = vmatpush3.bf16.msra.mxu0 %v3041_v22  ;;  %v3048_v22 = vld [vmem:[#allocation2 + $0xa0] sm:$0xff]  }
  0x53   : > { %2676 = vmatpush3.bf16.msra.mxu1 %v3035_v16  ;;  %v3042_v16 = vld [vmem:[#allocation2 + $0x70] sm:$0xff]  }
  0x54   : > { %2658 = vmatmul.mubr.msk.bf16.gmra.mrb[12].mxu0 %vm338_vm0, %v3027_v14  ;;  %2705 = vmatprep.subr.bf16.mxu0 %v3042_v16 }
  0x55   : > { %2706 = vmatpush3.bf16.msra.mxu0 %v3042_v16  ;;  %2725 = vmatprep.subr.bf16.mxu1 %v3044_v18 }
  0x56   : > { %2707 = vmatprep.subr.bf16.mxu0 %v3043_v17 }
  0x59   : > { %2708 = vmatpush3.bf16.msra.mxu0 %v3043_v17  ;;  %v3050_v17 = vld [vmem:[#allocation2 + $0xb0] sm:$0xff]  }
 0x10f   : > { %v2647_v24 = vpop.f32.mrb[0].mxu0 }
 0x110   : > { %v406_v25 = vadd.f32 %v2647_v24, %v2384_v23  ;;  %v397_v26 = vpop.f32.mrb[1].mxu0  ;;  %v2402_v24 = vld [vmem:[%s3529_s3 + $0x1] ss:$0 sm:$0xff] }
 0x111   : > { %v398_v27 = vadd.f32 %v2384_v23, %v397_v26  ;;  %v2648_v28 = vpop.f32.mrb[2].mxu0 }
 0x112   : > { %v409_v29 = vadd.f32 %v2648_v28, %v2384_v23  ;;  %v400_v30 = vpop.f32.mrb[3].mxu0  ;;  %v462_v32 = vmax.f32 %v406_v25, 0.0 }
 0x113   : > { %v401_v31 = vadd.f32 %v2384_v23, %v400_v30  ;;  %v460_v34 = vmax.f32 %v398_v27, 0.0 }
 0x114   : > { %v463_v33 = vmax.f32 %v409_v29, 0.0 }
 0x115   : > { %v461_v35 = vmax.f32 %v401_v31, 0.0 }
 0x116   : > { %v477_v36 = vpack.c.bf16 %v463_v33, %v462_v32 }
 0x117   : > { %v2651_v37 = vpop.f32.mrb[4].mxu0  ;;  %v476_v38 = vpack.c.bf16 %v461_v35, %v460_v34 }
 0x118   : > { %v422_v39 = vadd.f32 %v2651_v37, %v2384_v23  ;;  %v413_v40 = vpop.f32.mrb[5].mxu0 }
 0x119   : > { %v414_v41 = vadd.f32 %v2384_v23, %v413_v40  ;;  %v2652_v42 = vpop.f32.mrb[6].mxu0  ;;  %2677 = vmatprep.mubr.bf16.mxu1 %v476_v38 }
 0x11a   : > { %v425_v43 = vadd.f32 %v2652_v42, %v2384_v23  ;;  %v416_v44 = vpop.f32.mrb[7].mxu0  ;;  %2678 = vmatmul.mubr.bf16.vlgmr.msra.gmra.mrb[0].mxu1 %v477_v36  ;;  %v466_v46 = vmax.f32 %v422_v39, 0.0 }
 0x11b   : > { %v417_v45 = vadd.f32 %v2384_v23, %v416_v44  ;;  %v464_v48 = vmax.f32 %v414_v41, 0.0  ;;  %2726 = vmatpush3.bf16.msra.mxu1 %v3044_v18  ;;  %v3051_v18 = vld [vmem:[#allocation2 + $0xb8] sm:$0xff]  }
 0x11c   : > { %v467_v47 = vmax.f32 %v425_v43, 0.0  ;;  %2727 = vmatprep.subr.bf16.mxu1 %v3045_v19 }
 0x11d   : > { %v465_v49 = vmax.f32 %v417_v45, 0.0 }
 0x11e   : > { %v479_v50 = vpack.c.bf16 %v467_v47, %v466_v46 }
 0x11f   : > { %v478_v51 = vpack.c.bf16 %v465_v49, %v464_v48  ;;  %v2655_v52 = vpop.f32.mrb[8].mxu0  ;;  %2728 = vmatpush3.bf16.msra.mxu1 %v3045_v19  ;;  %v3052_v19 = vld [vmem:[#allocation2 + $0xc0] sm:$0xff]  }
 0x120   : > { %v438_v53 = vadd.f32 %v2655_v52, %v2384_v23  ;;  %v429_v54 = vpop.f32.mrb[9].mxu0  ;;  %2729 = vmatprep.subr.bf16.mxu1 %v3046_v20  ;;  %2757 = vmatprep.subr.bf16.mxu0 %v3052_v19 }
 0x121   : > { %v430_v55 = vadd.f32 %v2384_v23, %v429_v54  ;;  %v2656_v56 = vpop.f32.mrb[10].mxu0  ;;  %2681 = vmatprep.mubr.bf16.mxu1 %v478_v51 }
 0x122   : > { %v441_v57 = vadd.f32 %v2656_v56, %v2384_v23  ;;  %v432_v58 = vpop.f32.mrb[11].mxu0  ;;  %2682 = vmatmul.mubr.bf16.gmra.mrb[4].mxu1 %v479_v50  ;;  %v470_v60 = vmax.f32 %v438_v53, 0.0 }
 0x123   : > { %v433_v59 = vadd.f32 %v2384_v23, %v432_v58  ;;  %v468_v62 = vmax.f32 %v430_v55, 0.0  ;;  %2730 = vmatpush3.bf16.msra.mxu1 %v3046_v20  ;;  %v3053_v20 = vld [vmem:[#allocation2 + $0xc8] sm:$0xff]  }
 0x124   : > { %v471_v61 = vmax.f32 %v441_v57, 0.0  ;;  %2731 = vmatprep.subr.bf16.mxu1 %v3047_v21 }
 0x125   : > { %v469_v63 = vmax.f32 %v433_v59, 0.0 }
 0x126   : > { %v481_v0 = vpack.c.bf16 %v471_v61, %v470_v60 }
 0x127   : > { %v480_v1 = vpack.c.bf16 %v469_v63, %v468_v62  ;;  %v2659_v2 = vpop.f32.mrb[12].mxu0  ;;  %2732 = vmatpush3.bf16.msra.mxu1 %v3047_v21  ;;  %v3054_v21 = vld [vmem:[#allocation2 + $0xd0] sm:$0xff]  }
 0x128   : > { %v454_v3 = vadd.f32 %v2659_v2, %v2384_v23  ;;  %v445_v4 = vpop.f32.mrb[13].mxu0  ;;  %2733 = vmatprep.subr.bf16.mxu1 %v3048_v22 }
 0x129   : > { %v446_v5 = vadd.f32 %v2384_v23, %v445_v4  ;;  %v2660_v6 = vpop.f32.mrb[14].mxu0  ;;  %2685 = vmatprep.mubr.bf16.mxu1 %v480_v1 }
 0x12a   : > { %v457_v7 = vadd.f32 %v2660_v6, %v2384_v23  ;;  %v448_v8 = vpop.f32.mrb[15].mxu0  ;;  %2686 = vmatmul.mubr.bf16.gmra.mrb[8].mxu1 %v481_v0  ;;  %v474_v10 = vmax.f32 %v454_v3, 0.0 }
 0x12b   : > { %v449_v9 = vadd.f32 %v2384_v23, %v448_v8  ;;  %v472_v12 = vmax.f32 %v446_v5, 0.0  ;;  %v3049_v23 = vld [vmem:[#allocation2 + $0xa8] sm:$0xff]   ;;  %2734 = vmatpush3.bf16.msra.mxu1 %v3048_v22  ;;  %v3055_v22 = vld [vmem:[#allocation2 + $0xd8] sm:$0xff]  }
 0x12c   : > { %v475_v11 = vmax.f32 %v457_v7, 0.0  ;;  %2735 = vmatprep.subr.bf16.mxu1 %v3049_v23 }
 0x12d   : > { %v473_v13 = vmax.f32 %v449_v9, 0.0 }
 0x12e   : > { %v483_v14 = vpack.c.bf16 %v475_v11, %v474_v10 }
 0x12f   : > { %v482_v15 = vpack.c.bf16 %v473_v13, %v472_v12  ;;  %2736 = vmatpush3.bf16.msra.mxu1 %v3049_v23  ;;  %v3056_v23 = vld [vmem:[#allocation2 + $0xe0] sm:$0xff]  }
 0x130   : > { %2737 = vmatprep.subr.bf16.mxu1 %v3050_v17 }
 0x131   : > { %2689 = vmatprep.mubr.bf16.mxu1 %v482_v15 }
 0x132   : > { %2690 = vmatmul.mubr.bf16.gmra.mrb[12].mxu1 %v483_v14 }
 0x133   : > { %2738 = vmatpush3.bf16.msra.mxu1 %v3050_v17 }
 0x134   : > { %2739 = vmatprep.subr.bf16.mxu1 %v3051_v18 }
 0x137   : > { %2740 = vmatpush3.bf16.msra.mxu1 %v3051_v18  ;;  %v3058_v18 = vld [vmem:[#allocation2 + $0xf0] sm:$0xff]  }
 0x1ed   : > { %v2679_v25 = vpop.f32.mrb[0].mxu1 }
 0x1ee   : > { %v596_v26 = vadd.f32 %v2679_v25, %v2402_v24  ;;  %v587_v27 = vpop.f32.mrb[1].mxu1  ;;  %v2411_v25 = vld [vmem:[%s3529_s3 + $0x2] ss:$0 sm:$0xff] }
 0x1ef   : > { %v588_v28 = vadd.f32 %v2402_v24, %v587_v27  ;;  %v2680_v29 = vpop.f32.mrb[2].mxu1 }
 0x1f0   : > { %v599_v30 = vadd.f32 %v2680_v29, %v2402_v24  ;;  %v590_v31 = vpop.f32.mrb[3].mxu1  ;;  %v652_v33 = vmax.f32 %v596_v26, 0.0 }
 0x1f1   : > { %v591_v32 = vadd.f32 %v2402_v24, %v590_v31  ;;  %v650_v35 = vmax.f32 %v588_v28, 0.0 }
 0x1f2   : > { %v653_v34 = vmax.f32 %v599_v30, 0.0 }
 0x1f3   : > { %v651_v36 = vmax.f32 %v591_v32, 0.0 }
 0x1f4   : > { %v667_v37 = vpack.c.bf16 %v653_v34, %v652_v33 }
 0x1f5   : > { %v666_v38 = vpack.c.bf16 %v651_v36, %v650_v35  ;;  %v2683_v39 = vpop.f32.mrb[4].mxu1 }
 0x1f6   : > { %v612_v40 = vadd.f32 %v2683_v39, %v2402_v24  ;;  %v603_v41 = vpop.f32.mrb[5].mxu1 }
 0x1f7   : > { %v604_v42 = vadd.f32 %v2402_v24, %v603_v41  ;;  %v2684_v43 = vpop.f32.mrb[6].mxu1  ;;  %2709 = vmatprep.mubr.bf16.mxu0 %v666_v38 }
 0x1f8   : > { %v615_v44 = vadd.f32 %v2684_v43, %v2402_v24  ;;  %v606_v45 = vpop.f32.mrb[7].mxu1  ;;  %2710 = vmatmul.mubr.bf16.vlgmr.msra.gmra.mrb[16].mxu0 %v667_v37  ;;  %v656_v47 = vmax.f32 %v612_v40, 0.0 }
 0x1f9   : > { %v607_v46 = vadd.f32 %v2402_v24, %v606_v45  ;;  %v654_v49 = vmax.f32 %v604_v42, 0.0  ;;  %2758 = vmatpush3.bf16.msra.mxu0 %v3052_v19  ;;  %v3059_v19 = vld [vmem:[#allocation2 + $0xf8] sm:$0xff]  }
 0x1fa   : > { %v657_v48 = vmax.f32 %v615_v44, 0.0  ;;  %2759 = vmatprep.subr.bf16.mxu0 %v3053_v20 }
 0x1fb   : > { %v655_v50 = vmax.f32 %v607_v46, 0.0 }
 0x1fc   : > { %v669_v51 = vpack.c.bf16 %v657_v48, %v656_v47 }
 0x1fd   : > { %v668_v52 = vpack.c.bf16 %v655_v50, %v654_v49  ;;  %v2687_v53 = vpop.f32.mrb[8].mxu1  ;;  %2760 = vmatpush3.bf16.msra.mxu0 %v3053_v20  ;;  %v3060_v20 = vld [vmem:[#allocation2 + $0x100] sm:$0xff]  }
 0x1fe   : > { %v628_v54 = vadd.f32 %v2687_v53, %v2402_v24  ;;  %v619_v55 = vpop.f32.mrb[9].mxu1  ;;  %2761 = vmatprep.subr.bf16.mxu0 %v3054_v21  ;;  %2789 = vmatprep.subr.bf16.mxu1 %v3060_v20 }
 0x1ff   : > { %v620_v56 = vadd.f32 %v2402_v24, %v619_v55  ;;  %v2688_v57 = vpop.f32.mrb[10].mxu1  ;;  %2713 = vmatprep.mubr.bf16.mxu0 %v668_v52 }
 0x200   : > { %v631_v58 = vadd.f32 %v2688_v57, %v2402_v24  ;;  %v622_v59 = vpop.f32.mrb[11].mxu1  ;;  %2714 = vmatmul.mubr.bf16.gmra.mrb[20].mxu0 %v669_v51  ;;  %v660_v61 = vmax.f32 %v628_v54, 0.0 }
 0x201   : > { %v623_v60 = vadd.f32 %v2402_v24, %v622_v59  ;;  %v658_v63 = vmax.f32 %v620_v56, 0.0  ;;  %2762 = vmatpush3.bf16.msra.mxu0 %v3054_v21  ;;  %v3061_v21 = vld [vmem:[#allocation2 + $0x108] sm:$0xff]  }
 0x202   : > { %v661_v62 = vmax.f32 %v631_v58, 0.0  ;;  %2763 = vmatprep.subr.bf16.mxu0 %v3055_v22 }
 0x203   : > { %v659_v0 = vmax.f32 %v623_v60, 0.0 }
 0x204   : > { %v671_v1 = vpack.c.bf16 %v661_v62, %v660_v61 }
 0x205   : > { %v670_v2 = vpack.c.bf16 %v659_v0, %v658_v63  ;;  %v2691_v3 = vpop.f32.mrb[12].mxu1  ;;  %2764 = vmatpush3.bf16.msra.mxu0 %v3055_v22  ;;  %v3062_v22 = vld [vmem:[#allocation2 + $0x110] sm:$0xff]  }
 0x206   : > { %v644_v4 = vadd.f32 %v2691_v3, %v2402_v24  ;;  %v635_v5 = vpop.f32.mrb[13].mxu1  ;;  %2765 = vmatprep.subr.bf16.mxu0 %v3056_v23 }
 0x207   : > { %v636_v6 = vadd.f32 %v2402_v24, %v635_v5  ;;  %v2692_v7 = vpop.f32.mrb[14].mxu1  ;;  %2717 = vmatprep.mubr.bf16.mxu0 %v670_v2 }
 0x208   : > { %v647_v8 = vadd.f32 %v2692_v7, %v2402_v24  ;;  %v638_v9 = vpop.f32.mrb[15].mxu1  ;;  %2718 = vmatmul.mubr.bf16.gmra.mrb[24].mxu0 %v671_v1  ;;  %v664_v11 = vmax.f32 %v644_v4, 0.0 }
 0x209   : > { %v639_v10 = vadd.f32 %v2402_v24, %v638_v9  ;;  %v662_v13 = vmax.f32 %v636_v6, 0.0  ;;  %v3057_v24 = vld [vmem:[#allocation2 + $0xe8] sm:$0xff]   ;;  %2766 = vmatpush3.bf16.msra.mxu0 %v3056_v23  ;;  %v3063_v23 = vld [vmem:[#allocation2 + $0x118] sm:$0xff]  }
 0x20a   : > { %v665_v12 = vmax.f32 %v647_v8, 0.0  ;;  %2767 = vmatprep.subr.bf16.mxu0 %v3057_v24 }
 0x20b   : > { %v663_v14 = vmax.f32 %v639_v10, 0.0 }
 0x20c   : > { %v673_v15 = vpack.c.bf16 %v665_v12, %v664_v11 }
 0x20d   : > { %v672_v16 = vpack.c.bf16 %v663_v14, %v662_v13  ;;  %2768 = vmatpush3.bf16.msra.mxu0 %v3057_v24  ;;  %v3064_v24 = vld [vmem:[#allocation2 + $0x120] sm:$0xff]  }
 0x20e   : > { %2769 = vmatprep.subr.bf16.mxu0 %v3058_v18 }
 0x20f   : > { %2721 = vmatprep.mubr.bf16.mxu0 %v672_v16 }
 0x210   : > { %2722 = vmatmul.mubr.bf16.gmra.mrb[28].mxu0 %v673_v15 }
 0x211   : > { %2770 = vmatpush3.bf16.msra.mxu0 %v3058_v18 }
 0x212   : > { %2771 = vmatprep.subr.bf16.mxu0 %v3059_v19 }
 0x215   : > { %2772 = vmatpush3.bf16.msra.mxu0 %v3059_v19  ;;  %v3066_v19 = vld [vmem:[#allocation2 + $0x130] sm:$0xff]  }
 0x2cb   : > { %v2711_v26 = vpop.f32.mrb[16].mxu0 }
 0x2cc   : > { %v787_v27 = vadd.f32 %v2711_v26, %v2411_v25  ;;  %v778_v28 = vpop.f32.mrb[17].mxu0  ;;  %v2420_v26 = vld [vmem:[%s3529_s3 + $0x3] ss:$0 sm:$0xff] }
 0x2cd   : > { %v779_v29 = vadd.f32 %v2411_v25, %v778_v28  ;;  %v2712_v30 = vpop.f32.mrb[18].mxu0 }
 0x2ce   : > { %v790_v31 = vadd.f32 %v2712_v30, %v2411_v25  ;;  %v781_v32 = vpop.f32.mrb[19].mxu0  ;;  %v843_v34 = vmax.f32 %v787_v27, 0.0 }
 0x2cf   : > { %v782_v33 = vadd.f32 %v2411_v25, %v781_v32  ;;  %v841_v36 = vmax.f32 %v779_v29, 0.0 }
 0x2d0   : > { %v844_v35 = vmax.f32 %v790_v31, 0.0 }
 0x2d1   : > { %v842_v37 = vmax.f32 %v782_v33, 0.0 }
 0x2d2   : > { %v858_v38 = vpack.c.bf16 %v844_v35, %v843_v34 }
 0x2d3   : > { %v857_v39 = vpack.c.bf16 %v842_v37, %v841_v36  ;;  %v2715_v40 = vpop.f32.mrb[20].mxu0 }
 0x2d4   : > { %v803_v41 = vadd.f32 %v2715_v40, %v2411_v25  ;;  %v794_v42 = vpop.f32.mrb[21].mxu0 }
 0x2d5   : > { %v795_v43 = vadd.f32 %v2411_v25, %v794_v42  ;;  %v2716_v44 = vpop.f32.mrb[22].mxu0  ;;  %2741 = vmatprep.mubr.bf16.mxu1 %v857_v39 }
 0x2d6   : > { %v806_v45 = vadd.f32 %v2716_v44, %v2411_v25  ;;  %v797_v46 = vpop.f32.mrb[23].mxu0  ;;  %2742 = vmatmul.mubr.bf16.vlgmr.msra.gmra.mrb[16].mxu1 %v858_v38  ;;  %v847_v48 = vmax.f32 %v803_v41, 0.0 }
 0x2d7   : > { %v798_v47 = vadd.f32 %v2411_v25, %v797_v46  ;;  %v845_v50 = vmax.f32 %v795_v43, 0.0  ;;  %2790 = vmatpush3.bf16.msra.mxu1 %v3060_v20  ;;  %v3067_v20 = vld [vmem:[#allocation2 + $0x138] sm:$0xff]  }
 0x2d8   : > { %v848_v49 = vmax.f32 %v806_v45, 0.0  ;;  %2791 = vmatprep.subr.bf16.mxu1 %v3061_v21 }
 0x2d9   : > { %v846_v51 = vmax.f32 %v798_v47, 0.0 }
 0x2da   : > { %v860_v52 = vpack.c.bf16 %v848_v49, %v847_v48 }
 0x2db   : > { %v859_v53 = vpack.c.bf16 %v846_v51, %v845_v50  ;;  %v2719_v54 = vpop.f32.mrb[24].mxu0  ;;  %2792 = vmatpush3.bf16.msra.mxu1 %v3061_v21  ;;  %v3068_v21 = vld [vmem:[#allocation2 + $0x140] sm:$0xff]  }
 0x2dc   : > { %v819_v55 = vadd.f32 %v2719_v54, %v2411_v25  ;;  %v810_v56 = vpop.f32.mrb[25].mxu0  ;;  %2793 = vmatprep.subr.bf16.mxu1 %v3062_v22  ;;  %2821 = vmatprep.subr.bf16.mxu0 %v3068_v21 }
 0x2dd   : > { %v811_v57 = vadd.f32 %v2411_v25, %v810_v56  ;;  %v2720_v58 = vpop.f32.mrb[26].mxu0  ;;  %2745 = vmatprep.mubr.bf16.mxu1 %v859_v53 }
 0x2de   : > { %v822_v59 = vadd.f32 %v2720_v58, %v2411_v25  ;;  %v813_v60 = vpop.f32.mrb[27].mxu0  ;;  %2746 = vmatmul.mubr.bf16.gmra.mrb[20].mxu1 %v860_v52  ;;  %v851_v62 = vmax.f32 %v819_v55, 0.0 }
 0x2df   : > { %v814_v61 = vadd.f32 %v2411_v25, %v813_v60  ;;  %v849_v0 = vmax.f32 %v811_v57, 0.0  ;;  %2794 = vmatpush3.bf16.msra.mxu1 %v3062_v22  ;;  %v3069_v22 = vld [vmem:[#allocation2 + $0x148] sm:$0xff]  }
 0x2e0   : > { %v852_v63 = vmax.f32 %v822_v59, 0.0  ;;  %2795 = vmatprep.subr.bf16.mxu1 %v3063_v23 }
 0x2e1   : > { %v850_v1 = vmax.f32 %v814_v61, 0.0 }
 0x2e2   : > { %v862_v2 = vpack.c.bf16 %v852_v63, %v851_v62 }
 0x2e3   : > { %v861_v3 = vpack.c.bf16 %v850_v1, %v849_v0  ;;  %v2723_v4 = vpop.f32.mrb[28].mxu0  ;;  %2796 = vmatpush3.bf16.msra.mxu1 %v3063_v23  ;;  %v3070_v23 = vld [vmem:[#allocation2 + $0x150] sm:$0xff]  }
 0x2e4   : > { %v835_v5 = vadd.f32 %v2723_v4, %v2411_v25  ;;  %v826_v6 = vpop.f32.mrb[29].mxu0  ;;  %2797 = vmatprep.subr.bf16.mxu1 %v3064_v24 }
 0x2e5   : > { %v827_v7 = vadd.f32 %v2411_v25, %v826_v6  ;;  %v2724_v8 = vpop.f32.mrb[30].mxu0  ;;  %2749 = vmatprep.mubr.bf16.mxu1 %v861_v3 }
 0x2e6   : > { %v838_v9 = vadd.f32 %v2724_v8, %v2411_v25  ;;  %v829_v10 = vpop.f32.mrb[31].mxu0  ;;  %2750 = vmatmul.mubr.bf16.gmra.mrb[24].mxu1 %v862_v2  ;;  %v855_v12 = vmax.f32 %v835_v5, 0.0 }
 0x2e7   : > { %v830_v11 = vadd.f32 %v2411_v25, %v829_v10  ;;  %v853_v14 = vmax.f32 %v827_v7, 0.0  ;;  %v3065_v25 = vld [vmem:[#allocation2 + $0x128] sm:$0xff]   ;;  %2798 = vmatpush3.bf16.msra.mxu1 %v3064_v24  ;;  %v3071_v24 = vld [vmem:[#allocation2 + $0x158] sm:$0xff]  }
 0x2e8   : > { %v856_v13 = vmax.f32 %v838_v9, 0.0  ;;  %2799 = vmatprep.subr.bf16.mxu1 %v3065_v25 }
 0x2e9   : > { %v854_v15 = vmax.f32 %v830_v11, 0.0 }
 0x2ea   : > { %v864_v16 = vpack.c.bf16 %v856_v13, %v855_v12 }
 0x2eb   : > { %v863_v17 = vpack.c.bf16 %v854_v15, %v853_v14  ;;  %2800 = vmatpush3.bf16.msra.mxu1 %v3065_v25  ;;  %v3072_v25 = vld [vmem:[#allocation2 + $0x160] sm:$0xff]  }
 0x2ec   : > { %2801 = vmatprep.subr.bf16.mxu1 %v3066_v19 }
 0x2ed   : > { %2753 = vmatprep.mubr.bf16.mxu1 %v863_v17 }
 0x2ee   : > { %2754 = vmatmul.mubr.bf16.gmra.mrb[28].mxu1 %v864_v16 }
 0x2ef   : > { %2802 = vmatpush3.bf16.msra.mxu1 %v3066_v19 }
 0x2f0   : > { %2803 = vmatprep.subr.bf16.mxu1 %v3067_v20 }
 0x2f3   : > { %2804 = vmatpush3.bf16.msra.mxu1 %v3067_v20  ;;  %v3074_v20 = vld [vmem:[#allocation2 + $0x170] sm:$0xff]  }
 0x3a9   : > { %v2743_v27 = vpop.f32.mrb[16].mxu1 }
 0x3aa   : > { %v978_v28 = vadd.f32 %v2743_v27, %v2420_v26  ;;  %v969_v29 = vpop.f32.mrb[17].mxu1  ;;  %v2429_v27 = vld [vmem:[%s3529_s3 + $0x4] ss:$0 sm:$0xff] }
 0x3ab   : > { %v970_v30 = vadd.f32 %v2420_v26, %v969_v29  ;;  %v2744_v31 = vpop.f32.mrb[18].mxu1 }
 0x3ac   : > { %v981_v32 = vadd.f32 %v2744_v31, %v2420_v26  ;;  %v972_v33 = vpop.f32.mrb[19].mxu1  ;;  %v1034_v35 = vmax.f32 %v978_v28, 0.0 }
 0x3ad   : > { %v973_v34 = vadd.f32 %v2420_v26, %v972_v33  ;;  %v1032_v37 = vmax.f32 %v970_v30, 0.0 }
 0x3ae   : > { %v1035_v36 = vmax.f32 %v981_v32, 0.0 }
 0x3af   : > { %v1033_v38 = vmax.f32 %v973_v34, 0.0 }
 0x3b0   : > { %v1049_v39 = vpack.c.bf16 %v1035_v36, %v1034_v35 }
 0x3b1   : > { %v1048_v40 = vpack.c.bf16 %v1033_v38, %v1032_v37  ;;  %v2747_v41 = vpop.f32.mrb[20].mxu1 }
 0x3b2   : > { %v994_v42 = vadd.f32 %v2747_v41, %v2420_v26  ;;  %v985_v43 = vpop.f32.mrb[21].mxu1 }
 0x3b3   : > { %v986_v44 = vadd.f32 %v2420_v26, %v985_v43  ;;  %v2748_v45 = vpop.f32.mrb[22].mxu1  ;;  %2773 = vmatprep.mubr.bf16.mxu0 %v1048_v40 }
 0x3b4   : > { %v997_v46 = vadd.f32 %v2748_v45, %v2420_v26  ;;  %v988_v47 = vpop.f32.mrb[23].mxu1  ;;  %2774 = vmatmul.mubr.bf16.vlgmr.msra.gmra.mrb[32].mxu0 %v1049_v39  ;;  %v1038_v49 = vmax.f32 %v994_v42, 0.0 }
 0x3b5   : > { %v989_v48 = vadd.f32 %v2420_v26, %v988_v47  ;;  %v1036_v51 = vmax.f32 %v986_v44, 0.0  ;;  %2822 = vmatpush3.bf16.msra.mxu0 %v3068_v21  ;;  %v3075_v21 = vld [vmem:[#allocation2 + $0x178] sm:$0xff]  }
 0x3b6   : > { %v1039_v50 = vmax.f32 %v997_v46, 0.0  ;;  %2823 = vmatprep.subr.bf16.mxu0 %v3069_v22 }
 0x3b7   : > { %v1037_v52 = vmax.f32 %v989_v48, 0.0 }
 0x3b8   : > { %v1051_v53 = vpack.c.bf16 %v1039_v50, %v1038_v49 }
 0x3b9   : > { %v1050_v54 = vpack.c.bf16 %v1037_v52, %v1036_v51  ;;  %v2751_v55 = vpop.f32.mrb[24].mxu1  ;;  %2824 = vmatpush3.bf16.msra.mxu0 %v3069_v22  ;;  %v3076_v22 = vld [vmem:[#allocation2 + $0x180] sm:$0xff]  }
 0x3ba   : > { %v1010_v56 = vadd.f32 %v2751_v55, %v2420_v26  ;;  %v1001_v57 = vpop.f32.mrb[25].mxu1  ;;  %2825 = vmatprep.subr.bf16.mxu0 %v3070_v23  ;;  %2853 = vmatprep.subr.bf16.mxu1 %v3076_v22 }
 0x3bb   : > { %v1002_v58 = vadd.f32 %v2420_v26, %v1001_v57  ;;  %v2752_v59 = vpop.f32.mrb[26].mxu1  ;;  %2777 = vmatprep.mubr.bf16.mxu0 %v1050_v54 }
 0x3bc   : > { %v1013_v60 = vadd.f32 %v2752_v59, %v2420_v26  ;;  %v1004_v61 = vpop.f32.mrb[27].mxu1  ;;  %2778 = vmatmul.mubr.bf16.gmra.mrb[36].mxu0 %v1051_v53  ;;  %v1042_v63 = vmax.f32 %v1010_v56, 0.0 }
 0x3bd   : > { %v1005_v62 = vadd.f32 %v2420_v26, %v1004_v61  ;;  %v1040_v1 = vmax.f32 %v1002_v58, 0.0  ;;  %2826 = vmatpush3.bf16.msra.mxu0 %v3070_v23  ;;  %v3077_v23 = vld [vmem:[#allocation2 + $0x188] sm:$0xff]  }
 0x3be   : > { %v1043_v0 = vmax.f32 %v1013_v60, 0.0  ;;  %2827 = vmatprep.subr.bf16.mxu0 %v3071_v24 }
 0x3bf   : > { %v1041_v2 = vmax.f32 %v1005_v62, 0.0 }
 0x3c0   : > { %v1053_v3 = vpack.c.bf16 %v1043_v0, %v1042_v63 }
 0x3c1   : > { %v1052_v4 = vpack.c.bf16 %v1041_v2, %v1040_v1  ;;  %v2755_v5 = vpop.f32.mrb[28].mxu1  ;;  %2828 = vmatpush3.bf16.msra.mxu0 %v3071_v24  ;;  %v3078_v24 = vld [vmem:[#allocation2 + $0x190] sm:$0xff]  }
 0x3c2   : > { %v1026_v6 = vadd.f32 %v2755_v5, %v2420_v26  ;;  %v1017_v7 = vpop.f32.mrb[29].mxu1  ;;  %2829 = vmatprep.subr.bf16.mxu0 %v3072_v25 }
 0x3c3   : > { %v1018_v8 = vadd.f32 %v2420_v26, %v1017_v7  ;;  %v2756_v9 = vpop.f32.mrb[30].mxu1  ;;  %2781 = vmatprep.mubr.bf16.mxu0 %v1052_v4 }
 0x3c4   : > { %v1029_v10 = vadd.f32 %v2756_v9, %v2420_v26  ;;  %v1020_v11 = vpop.f32.mrb[31].mxu1  ;;  %2782 = vmatmul.mubr.bf16.gmra.mrb[40].mxu0 %v1053_v3  ;;  %v1046_v13 = vmax.f32 %v1026_v6, 0.0 }
 0x3c5   : > { %v1021_v12 = vadd.f32 %v2420_v26, %v1020_v11  ;;  %v1044_v15 = vmax.f32 %v1018_v8, 0.0  ;;  %v3073_v26 = vld [vmem:[#allocation2 + $0x168] sm:$0xff]   ;;  %2830 = vmatpush3.bf16.msra.mxu0 %v3072_v25  ;;  %v3079_v25 = vld [vmem:[#allocation2 + $0x198] sm:$0xff]  }
 0x3c6   : > { %v1047_v14 = vmax.f32 %v1029_v10, 0.0  ;;  %2831 = vmatprep.subr.bf16.mxu0 %v3073_v26 }
 0x3c7   : > { %v1045_v16 = vmax.f32 %v1021_v12, 0.0 }
 0x3c8   : > { %v1055_v17 = vpack.c.bf16 %v1047_v14, %v1046_v13 }
 0x3c9   : > { %v1054_v18 = vpack.c.bf16 %v1045_v16, %v1044_v15  ;;  %2832 = vmatpush3.bf16.msra.mxu0 %v3073_v26  ;;  %v3080_v26 = vld [vmem:[#allocation2 + $0x1a0] sm:$0xff]  }
 0x3ca   : > { %2833 = vmatprep.subr.bf16.mxu0 %v3074_v20 }
 0x3cb   : > { %2785 = vmatprep.mubr.bf16.mxu0 %v1054_v18 }
 0x3cc   : > { %2786 = vmatmul.mubr.bf16.gmra.mrb[44].mxu0 %v1055_v17 }
 0x3cd   : > { %2834 = vmatpush3.bf16.msra.mxu0 %v3074_v20 }
 0x3ce   : > { %2835 = vmatprep.subr.bf16.mxu0 %v3075_v21 }
 0x3d1   : > { %2836 = vmatpush3.bf16.msra.mxu0 %v3075_v21  ;;  %v3082_v21 = vld [vmem:[#allocation2 + $0x1b0] sm:$0xff]  }
 0x487   : > { %v2775_v28 = vpop.f32.mrb[32].mxu0 }
 0x488   : > { %v1169_v29 = vadd.f32 %v2775_v28, %v2429_v27  ;;  %v1160_v30 = vpop.f32.mrb[33].mxu0  ;;  %v2438_v28 = vld [vmem:[%s3529_s3 + $0x5] ss:$0 sm:$0xff] }
 0x489   : > { %v1161_v31 = vadd.f32 %v2429_v27, %v1160_v30  ;;  %v2776_v32 = vpop.f32.mrb[34].mxu0 }
 0x48a   : > { %v1172_v33 = vadd.f32 %v2776_v32, %v2429_v27  ;;  %v1163_v34 = vpop.f32.mrb[35].mxu0  ;;  %v1225_v36 = vmax.f32 %v1169_v29, 0.0 }
 0x48b   : > { %v1164_v35 = vadd.f32 %v2429_v27, %v1163_v34  ;;  %v1223_v38 = vmax.f32 %v1161_v31, 0.0 }
 0x48c   : > { %v1226_v37 = vmax.f32 %v1172_v33, 0.0 }
 0x48d   : > { %v1224_v39 = vmax.f32 %v1164_v35, 0.0 }
 0x48e   : > { %v1240_v40 = vpack.c.bf16 %v1226_v37, %v1225_v36 }
 0x48f   : > { %v1239_v41 = vpack.c.bf16 %v1224_v39, %v1223_v38  ;;  %v2779_v42 = vpop.f32.mrb[36].mxu0 }
 0x490   : > { %v1185_v43 = vadd.f32 %v2779_v42, %v2429_v27  ;;  %v1176_v44 = vpop.f32.mrb[37].mxu0 }
 0x491   : > { %v1177_v45 = vadd.f32 %v2429_v27, %v1176_v44  ;;  %v2780_v46 = vpop.f32.mrb[38].mxu0  ;;  %2805 = vmatprep.mubr.bf16.mxu1 %v1239_v41 }
 0x492   : > { %v1188_v47 = vadd.f32 %v2780_v46, %v2429_v27  ;;  %v1179_v48 = vpop.f32.mrb[39].mxu0  ;;  %2806 = vmatmul.mubr.bf16.vlgmr.msra.gmra.mrb[32].mxu1 %v1240_v40  ;;  %v1229_v50 = vmax.f32 %v1185_v43, 0.0 }
 0x493   : > { %v1180_v49 = vadd.f32 %v2429_v27, %v1179_v48  ;;  %v1227_v52 = vmax.f32 %v1177_v45, 0.0  ;;  %2854 = vmatpush3.bf16.msra.mxu1 %v3076_v22  ;;  %v3083_v22 = vld [vmem:[#allocation2 + $0x1b8] sm:$0xff]  }
 0x494   : > { %v1230_v51 = vmax.f32 %v1188_v47, 0.0  ;;  %2855 = vmatprep.subr.bf16.mxu1 %v3077_v23 }
 0x495   : > { %v1228_v53 = vmax.f32 %v1180_v49, 0.0 }
 0x496   : > { %v1242_v54 = vpack.c.bf16 %v1230_v51, %v1229_v50 }
 0x497   : > { %v1241_v55 = vpack.c.bf16 %v1228_v53, %v1227_v52  ;;  %v2783_v56 = vpop.f32.mrb[40].mxu0  ;;  %2856 = vmatpush3.bf16.msra.mxu1 %v3077_v23  ;;  %v3084_v23 = vld [vmem:[#allocation2 + $0x1c0] sm:$0xff]  }
 0x498   : > { %v1201_v57 = vadd.f32 %v2783_v56, %v2429_v27  ;;  %v1192_v58 = vpop.f32.mrb[41].mxu0  ;;  %2857 = vmatprep.subr.bf16.mxu1 %v3078_v24  ;;  %2885 = vmatprep.subr.bf16.mxu0 %v3084_v23 }
 0x499   : > { %v1193_v59 = vadd.f32 %v2429_v27, %v1192_v58  ;;  %v2784_v60 = vpop.f32.mrb[42].mxu0  ;;  %2809 = vmatprep.mubr.bf16.mxu1 %v1241_v55 }
 0x49a   : > { %v1204_v61 = vadd.f32 %v2784_v60, %v2429_v27  ;;  %v1195_v62 = vpop.f32.mrb[43].mxu0  ;;  %2810 = vmatmul.mubr.bf16.gmra.mrb[36].mxu1 %v1242_v54  ;;  %v1233_v0 = vmax.f32 %v1201_v57, 0.0 }
 0x49b   : > { %v1196_v63 = vadd.f32 %v2429_v27, %v1195_v62  ;;  %v1231_v2 = vmax.f32 %v1193_v59, 0.0  ;;  %2858 = vmatpush3.bf16.msra.mxu1 %v3078_v24  ;;  %v3085_v24 = vld [vmem:[#allocation2 + $0x1c8] sm:$0xff]  }
 0x49c   : > { %v1234_v1 = vmax.f32 %v1204_v61, 0.0  ;;  %2859 = vmatprep.subr.bf16.mxu1 %v3079_v25 }
 0x49d   : > { %v1232_v3 = vmax.f32 %v1196_v63, 0.0 }
 0x49e   : > { %v1244_v4 = vpack.c.bf16 %v1234_v1, %v1233_v0 }
 0x49f   : > { %v1243_v5 = vpack.c.bf16 %v1232_v3, %v1231_v2  ;;  %v2787_v6 = vpop.f32.mrb[44].mxu0  ;;  %2860 = vmatpush3.bf16.msra.mxu1 %v3079_v25  ;;  %v3086_v25 = vld [vmem:[#allocation2 + $0x1d0] sm:$0xff]  }
 0x4a0   : > { %v1217_v7 = vadd.f32 %v2787_v6, %v2429_v27  ;;  %v1208_v8 = vpop.f32.mrb[45].mxu0  ;;  %2861 = vmatprep.subr.bf16.mxu1 %v3080_v26 }
 0x4a1   : > { %v1209_v9 = vadd.f32 %v2429_v27, %v1208_v8  ;;  %v2788_v10 = vpop.f32.mrb[46].mxu0  ;;  %2813 = vmatprep.mubr.bf16.mxu1 %v1243_v5 }
 0x4a2   : > { %v1220_v11 = vadd.f32 %v2788_v10, %v2429_v27  ;;  %v1211_v12 = vpop.f32.mrb[47].mxu0  ;;  %2814 = vmatmul.mubr.bf16.gmra.mrb[40].mxu1 %v1244_v4  ;;  %v1237_v14 = vmax.f32 %v1217_v7, 0.0 }
 0x4a3   : > { %v1212_v13 = vadd.f32 %v2429_v27, %v1211_v12  ;;  %v1235_v16 = vmax.f32 %v1209_v9, 0.0  ;;  %v3081_v27 = vld [vmem:[#allocation2 + $0x1a8] sm:$0xff]   ;;  %2862 = vmatpush3.bf16.msra.mxu1 %v3080_v26  ;;  %v3087_v26 = vld [vmem:[#allocation2 + $0x1d8] sm:$0xff]  }
 0x4a4   : > { %v1238_v15 = vmax.f32 %v1220_v11, 0.0  ;;  %2863 = vmatprep.subr.bf16.mxu1 %v3081_v27 }
 0x4a5   : > { %v1236_v17 = vmax.f32 %v1212_v13, 0.0 }
 0x4a6   : > { %v1246_v18 = vpack.c.bf16 %v1238_v15, %v1237_v14 }
 0x4a7   : > { %v1245_v19 = vpack.c.bf16 %v1236_v17, %v1235_v16  ;;  %2864 = vmatpush3.bf16.msra.mxu1 %v3081_v27  ;;  %v3088_v27 = vld [vmem:[#allocation2 + $0x1e0] sm:$0xff]  }
 0x4a8   : > { %2865 = vmatprep.subr.bf16.mxu1 %v3082_v21 }
 0x4a9   : > { %2817 = vmatprep.mubr.bf16.mxu1 %v1245_v19 }
 0x4aa   : > { %2818 = vmatmul.mubr.bf16.gmra.mrb[44].mxu1 %v1246_v18 }
 0x4ab   : > { %2866 = vmatpush3.bf16.msra.mxu1 %v3082_v21 }
 0x4ac   : > { %2867 = vmatprep.subr.bf16.mxu1 %v3083_v22 }
 0x4af   : > { %2868 = vmatpush3.bf16.msra.mxu1 %v3083_v22  ;;  %v3090_v22 = vld [vmem:[#allocation2 + $0x1f0] sm:$0xff]  }
 0x565   : > { %v2807_v29 = vpop.f32.mrb[32].mxu1 }
 0x566   : > { %v1360_v30 = vadd.f32 %v2807_v29, %v2438_v28  ;;  %v1351_v31 = vpop.f32.mrb[33].mxu1  ;;  %v2447_v29 = vld [vmem:[%s3529_s3 + $0x6] ss:$0 sm:$0xff] }
 0x567   : > { %v1352_v32 = vadd.f32 %v2438_v28, %v1351_v31  ;;  %v2808_v33 = vpop.f32.mrb[34].mxu1 }
 0x568   : > { %v1363_v34 = vadd.f32 %v2808_v33, %v2438_v28  ;;  %v1354_v35 = vpop.f32.mrb[35].mxu1  ;;  %v1416_v37 = vmax.f32 %v1360_v30, 0.0 }
 0x569   : > { %v1355_v36 = vadd.f32 %v2438_v28, %v1354_v35  ;;  %v1414_v39 = vmax.f32 %v1352_v32, 0.0 }
 0x56a   : > { %v1417_v38 = vmax.f32 %v1363_v34, 0.0 }
 0x56b   : > { %v1415_v40 = vmax.f32 %v1355_v36, 0.0 }
 0x56c   : > { %v1431_v41 = vpack.c.bf16 %v1417_v38, %v1416_v37 }
 0x56d   : > { %v1430_v42 = vpack.c.bf16 %v1415_v40, %v1414_v39  ;;  %v2811_v43 = vpop.f32.mrb[36].mxu1 }
 0x56e   : > { %v1376_v44 = vadd.f32 %v2811_v43, %v2438_v28  ;;  %v1367_v45 = vpop.f32.mrb[37].mxu1 }
 0x56f   : > { %v1368_v46 = vadd.f32 %v2438_v28, %v1367_v45  ;;  %v2812_v47 = vpop.f32.mrb[38].mxu1  ;;  %2837 = vmatprep.mubr.bf16.mxu0 %v1430_v42 }
 0x570   : > { %v1379_v48 = vadd.f32 %v2812_v47, %v2438_v28  ;;  %v1370_v49 = vpop.f32.mrb[39].mxu1  ;;  %2838 = vmatmul.mubr.bf16.vlgmr.msra.gmra.mrb[48].mxu0 %v1431_v41  ;;  %v1420_v51 = vmax.f32 %v1376_v44, 0.0 }
 0x571   : > { %v1371_v50 = vadd.f32 %v2438_v28, %v1370_v49  ;;  %v1418_v53 = vmax.f32 %v1368_v46, 0.0  ;;  %2886 = vmatpush3.bf16.msra.mxu0 %v3084_v23  ;;  %v3091_v23 = vld [vmem:[#allocation2 + $0x1f8] sm:$0xff]  }
 0x572   : > { %v1421_v52 = vmax.f32 %v1379_v48, 0.0  ;;  %2887 = vmatprep.subr.bf16.mxu0 %v3085_v24 }
 0x573   : > { %v1419_v54 = vmax.f32 %v1371_v50, 0.0 }
 0x574   : > { %v1433_v55 = vpack.c.bf16 %v1421_v52, %v1420_v51 }
 0x575   : > { %v1432_v56 = vpack.c.bf16 %v1419_v54, %v1418_v53  ;;  %v2815_v57 = vpop.f32.mrb[40].mxu1  ;;  %2888 = vmatpush3.bf16.msra.mxu0 %v3085_v24  ;;  %v3092_v24 = vld [vmem:[#allocation2 + $0x200] sm:$0xff]  }
 0x576   : > { %v1392_v58 = vadd.f32 %v2815_v57, %v2438_v28  ;;  %v1383_v59 = vpop.f32.mrb[41].mxu1  ;;  %2889 = vmatprep.subr.bf16.mxu0 %v3086_v25  ;;  %2949 = vmatprep.subr.bf16.mxu1 %v3092_v24 }
 0x577   : > { %v1384_v60 = vadd.f32 %v2438_v28, %v1383_v59  ;;  %v2816_v61 = vpop.f32.mrb[42].mxu1  ;;  %2841 = vmatprep.mubr.bf16.mxu0 %v1432_v56 }
 0x578   : > { %v1395_v62 = vadd.f32 %v2816_v61, %v2438_v28  ;;  %v1386_v63 = vpop.f32.mrb[43].mxu1  ;;  %2842 = vmatmul.mubr.bf16.gmra.mrb[52].mxu0 %v1433_v55  ;;  %v1424_v1 = vmax.f32 %v1392_v58, 0.0 }
 0x579   : > { %v1387_v0 = vadd.f32 %v2438_v28, %v1386_v63  ;;  %v1422_v3 = vmax.f32 %v1384_v60, 0.0  ;;  %2890 = vmatpush3.bf16.msra.mxu0 %v3086_v25  ;;  %v3093_v25 = vld [vmem:[#allocation2 + $0x208] sm:$0xff]  }
 0x57a   : > { %v1425_v2 = vmax.f32 %v1395_v62, 0.0  ;;  %2891 = vmatprep.subr.bf16.mxu0 %v3087_v26 }
 0x57b   : > { %v1423_v4 = vmax.f32 %v1387_v0, 0.0 }
 0x57c   : > { %v1435_v5 = vpack.c.bf16 %v1425_v2, %v1424_v1 }
 0x57d   : > { %v1434_v6 = vpack.c.bf16 %v1423_v4, %v1422_v3  ;;  %v2819_v7 = vpop.f32.mrb[44].mxu1  ;;  %2892 = vmatpush3.bf16.msra.mxu0 %v3087_v26  ;;  %v3094_v26 = vld [vmem:[#allocation2 + $0x210] sm:$0xff]  }
 0x57e   : > { %v1408_v8 = vadd.f32 %v2819_v7, %v2438_v28  ;;  %v1399_v9 = vpop.f32.mrb[45].mxu1  ;;  %2893 = vmatprep.subr.bf16.mxu0 %v3088_v27 }
 0x57f   : > { %v1400_v10 = vadd.f32 %v2438_v28, %v1399_v9  ;;  %v2820_v11 = vpop.f32.mrb[46].mxu1  ;;  %2845 = vmatprep.mubr.bf16.mxu0 %v1434_v6 }
 0x580   : > { %v1411_v12 = vadd.f32 %v2820_v11, %v2438_v28  ;;  %v1402_v13 = vpop.f32.mrb[47].mxu1  ;;  %2846 = vmatmul.mubr.bf16.gmra.mrb[56].mxu0 %v1435_v5  ;;  %v1428_v15 = vmax.f32 %v1408_v8, 0.0 }
 0x581   : > { %v1403_v14 = vadd.f32 %v2438_v28, %v1402_v13  ;;  %v1426_v17 = vmax.f32 %v1400_v10, 0.0  ;;  %v3089_v28 = vld [vmem:[#allocation2 + $0x1e8] sm:$0xff]   ;;  %2894 = vmatpush3.bf16.msra.mxu0 %v3088_v27  ;;  %v3366_v27 = vld [vmem:[#allocation2 + $0x218] sm:$0xff]  }
 0x582   : > { %v1429_v16 = vmax.f32 %v1411_v12, 0.0  ;;  %2895 = vmatprep.subr.bf16.mxu0 %v3089_v28 }
 0x583   : > { %v1427_v18 = vmax.f32 %v1403_v14, 0.0 }
 0x584   : > { %v1437_v19 = vpack.c.bf16 %v1429_v16, %v1428_v15 }
 0x585   : > { %v1436_v20 = vpack.c.bf16 %v1427_v18, %v1426_v17  ;;  %2896 = vmatpush3.bf16.msra.mxu0 %v3089_v28  ;;  %v3369_v28 = vld [vmem:[#allocation2 + $0x220] sm:$0xff]  }
 0x586   : > { %2897 = vmatprep.subr.bf16.mxu0 %v3090_v22 }
 0x587   : > { %2849 = vmatprep.mubr.bf16.mxu0 %v1436_v20 }
 0x588   : > { %2850 = vmatmul.mubr.bf16.gmra.mrb[60].mxu0 %v1437_v19 }
 0x589   : > { %2898 = vmatpush3.bf16.msra.mxu0 %v3090_v22 }
 0x58a   : > { %2899 = vmatprep.subr.bf16.mxu0 %v3091_v23 }
 0x58d   : > { %2900 = vmatpush3.bf16.msra.mxu0 %v3091_v23  ;;  %v3098_v23 = vld [vmem:[#allocation2 + $0x230] sm:$0xff]  }
 0x58e   : > { %2917 = vmatprep.subr.bf16.mxu0 %v3092_v24 }
 0x643   : > { %v2839_v30 = vpop.f32.mrb[48].mxu0 }
 0x644   : > { %v1551_v31 = vadd.f32 %v2839_v30, %v2447_v29  ;;  %v1542_v32 = vpop.f32.mrb[49].mxu0  ;;  %v3381_v30 = vld [vmem:[%s3529_s3 + $0x7] ss:$0 sm:$0xff] }
 0x645   : > { %v1543_v33 = vadd.f32 %v2447_v29, %v1542_v32  ;;  %v2840_v34 = vpop.f32.mrb[50].mxu0 }
 0x646   : > { %v1554_v35 = vadd.f32 %v2840_v34, %v2447_v29  ;;  %v1545_v36 = vpop.f32.mrb[51].mxu0  ;;  %v1607_v38 = vmax.f32 %v1551_v31, 0.0 }
 0x647   : > { %v1546_v37 = vadd.f32 %v2447_v29, %v1545_v36  ;;  %v1605_v40 = vmax.f32 %v1543_v33, 0.0 }
 0x648   : > { %v1608_v39 = vmax.f32 %v1554_v35, 0.0 }
 0x649   : > { %v1606_v41 = vmax.f32 %v1546_v37, 0.0 }
 0x64a   : > { %v1622_v42 = vpack.c.bf16 %v1608_v39, %v1607_v38 }
 0x64b   : > { %v1621_v43 = vpack.c.bf16 %v1606_v41, %v1605_v40  ;;  %v2843_v44 = vpop.f32.mrb[52].mxu0 }
 0x64c   : > { %v1567_v45 = vadd.f32 %v2843_v44, %v2447_v29  ;;  %v1558_v46 = vpop.f32.mrb[53].mxu0 }
 0x64d   : > { %v1559_v47 = vadd.f32 %v2447_v29, %v1558_v46  ;;  %v2844_v48 = vpop.f32.mrb[54].mxu0  ;;  %2869 = vmatprep.mubr.bf16.mxu1 %v1621_v43 }
 0x64e   : > { %v1570_v49 = vadd.f32 %v2844_v48, %v2447_v29  ;;  %v1561_v50 = vpop.f32.mrb[55].mxu0  ;;  %2870 = vmatmul.mubr.bf16.vlgmr.msra.gmra.mrb[48].mxu1 %v1622_v42  ;;  %v1611_v52 = vmax.f32 %v1567_v45, 0.0 }
 0x64f   : > { %v1562_v51 = vadd.f32 %v2447_v29, %v1561_v50  ;;  %v1609_v54 = vmax.f32 %v1559_v47, 0.0  ;;  %2957 = vmatpush3.bf16.msra.mxu1 %v3092_v24 }
 0x650   : > { %v1612_v53 = vmax.f32 %v1570_v49, 0.0  ;;  %2950 = vmatprep.subr.bf16.mxu1 %v3093_v25 }
 0x651   : > { %v1610_v55 = vmax.f32 %v1562_v51, 0.0 }
 0x652   : > { %v1624_v56 = vpack.c.bf16 %v1612_v53, %v1611_v52 }
 0x653   : > { %v1623_v57 = vpack.c.bf16 %v1610_v55, %v1609_v54  ;;  %v2847_v58 = vpop.f32.mrb[56].mxu0  ;;  %2958 = vmatpush3.bf16.msra.mxu1 %v3093_v25 }
 0x654   : > { %v1583_v59 = vadd.f32 %v2847_v58, %v2447_v29  ;;  %v1574_v60 = vpop.f32.mrb[57].mxu0  ;;  %2951 = vmatprep.subr.bf16.mxu1 %v3094_v26 }
 0x655   : > { %v1575_v61 = vadd.f32 %v2447_v29, %v1574_v60  ;;  %v2848_v62 = vpop.f32.mrb[58].mxu0  ;;  %2873 = vmatprep.mubr.bf16.mxu1 %v1623_v57 }
 0x656   : > { %v1586_v63 = vadd.f32 %v2848_v62, %v2447_v29  ;;  %v1577_v0 = vpop.f32.mrb[59].mxu0  ;;  %2874 = vmatmul.mubr.bf16.gmra.mrb[52].mxu1 %v1624_v56  ;;  %v1615_v2 = vmax.f32 %v1583_v59, 0.0 }
 0x657   : > { %v1578_v1 = vadd.f32 %v2447_v29, %v1577_v0  ;;  %v1613_v4 = vmax.f32 %v1575_v61, 0.0  ;;  %2959 = vmatpush3.bf16.msra.mxu1 %v3094_v26 }
 0x658   : > { %v1616_v3 = vmax.f32 %v1586_v63, 0.0  ;;  %2952 = vmatprep.subr.bf16.mxu1 %v3366_v27 }
 0x659   : > { %v1614_v5 = vmax.f32 %v1578_v1, 0.0 }
 0x65a   : > { %v1626_v6 = vpack.c.bf16 %v1616_v3, %v1615_v2 }
 0x65b   : > { %v1625_v7 = vpack.c.bf16 %v1614_v5, %v1613_v4  ;;  %v2851_v8 = vpop.f32.mrb[60].mxu0  ;;  %2960 = vmatpush3.bf16.msra.mxu1 %v3366_v27 }
 0x65c   : > { %v1599_v9 = vadd.f32 %v2851_v8, %v2447_v29  ;;  %v1590_v10 = vpop.f32.mrb[61].mxu0  ;;  %2953 = vmatprep.subr.bf16.mxu1 %v3369_v28 }
 0x65d   : > { %v1591_v11 = vadd.f32 %v2447_v29, %v1590_v10  ;;  %v2852_v12 = vpop.f32.mrb[62].mxu0  ;;  %2877 = vmatprep.mubr.bf16.mxu1 %v1625_v7 }
 0x65e   : > { %v1602_v13 = vadd.f32 %v2852_v12, %v2447_v29  ;;  %v1593_v14 = vpop.f32.mrb[63].mxu0  ;;  %2878 = vmatmul.mubr.bf16.gmra.mrb[56].mxu1 %v1626_v6  ;;  %v1619_v16 = vmax.f32 %v1599_v9, 0.0 }
 0x65f   : > { %v1594_v15 = vadd.f32 %v2447_v29, %v1593_v14  ;;  %v1617_v18 = vmax.f32 %v1591_v11, 0.0  ;;  %v3373_v29 = vld [vmem:[#allocation2 + $0x228] sm:$0xff]   ;;  %2961 = vmatpush3.bf16.msra.mxu1 %v3369_v28 }
 0x660   : > { %v1620_v17 = vmax.f32 %v1602_v13, 0.0  ;;  %2954 = vmatprep.subr.bf16.mxu1 %v3373_v29 }
 0x661   : > { %v1618_v19 = vmax.f32 %v1594_v15, 0.0 }
 0x662   : > { %v1628_v20 = vpack.c.bf16 %v1620_v17, %v1619_v16 }
 0x663   : > { %v1627_v21 = vpack.c.bf16 %v1618_v19, %v1617_v18  ;;  %2962 = vmatpush3.bf16.msra.mxu1 %v3373_v29 }
 0x664   : > { %2955 = vmatprep.subr.bf16.mxu1 %v3098_v23 }
 0x665   : > { %2881 = vmatprep.mubr.bf16.mxu1 %v1627_v21 }
 0x666   : > { %2882 = vmatmul.mubr.bf16.gmra.mrb[60].mxu1 %v1628_v20 }
 0x667   : > { %2963 = vmatpush3.bf16.msra.mxu1 %v3098_v23 }
 0x721   : > { %v2871_v31 = vpop.f32.mrb[48].mxu1 }
 0x722   : > { %v1742_v32 = vadd.f32 %v2871_v31, %v3381_v30  ;;  %v1733_v33 = vpop.f32.mrb[49].mxu1 }
 0x723   : > { %v1734_v34 = vadd.f32 %v3381_v30, %v1733_v33  ;;  %v2872_v35 = vpop.f32.mrb[50].mxu1 }
 0x724   : > { %v1745_v36 = vadd.f32 %v2872_v35, %v3381_v30  ;;  %v1736_v37 = vpop.f32.mrb[51].mxu1  ;;  %v1798_v39 = vmax.f32 %v1742_v32, 0.0 }
 0x725   : > { %v1737_v38 = vadd.f32 %v3381_v30, %v1736_v37  ;;  %v1796_v41 = vmax.f32 %v1734_v34, 0.0 }
 0x726   : > { %v1799_v40 = vmax.f32 %v1745_v36, 0.0 }
 0x727   : > { %v1797_v42 = vmax.f32 %v1737_v38, 0.0 }
 0x728   : > { %v1813_v43 = vpack.c.bf16 %v1799_v40, %v1798_v39 }
 0x729   : > { %v1812_v44 = vpack.c.bf16 %v1797_v42, %v1796_v41  ;;  %v2875_v45 = vpop.f32.mrb[52].mxu1 }
 0x72a   : > { %v1758_v46 = vadd.f32 %v2875_v45, %v3381_v30  ;;  %v1749_v47 = vpop.f32.mrb[53].mxu1 }
 0x72b   : > { %v1750_v48 = vadd.f32 %v3381_v30, %v1749_v47  ;;  %v2876_v49 = vpop.f32.mrb[54].mxu1  ;;  %2901 = vmatprep.mubr.bf16.mxu0 %v1812_v44 }
 0x72c   : > { %v1761_v50 = vadd.f32 %v2876_v49, %v3381_v30  ;;  %v1752_v51 = vpop.f32.mrb[55].mxu1  ;;  %2902 = vmatmul.mubr.bf16.vlgmr.msra.gmra.mrb[64].mxu0 %v1813_v43  ;;  %v1802_v53 = vmax.f32 %v1758_v46, 0.0 }
 0x72d   : > { %v1753_v52 = vadd.f32 %v3381_v30, %v1752_v51  ;;  %2918 = vmatpush3.bf16.msra.mxu0 %v3092_v24  ;;  %v1800_v55 = vmax.f32 %v1750_v48, 0.0  ;;  %v3099_v24 = vld [vmem:[#allocation2 + $0x238] sm:$0xff]  }
 0x72e   : > { %v1803_v54 = vmax.f32 %v1761_v50, 0.0  ;;  %2919 = vmatprep.subr.bf16.mxu0 %v3093_v25  ;;  %2956 = vmatprep.subr.bf16.mxu1 %v3099_v24 }
 0x72f   : > { %v1801_v56 = vmax.f32 %v1753_v52, 0.0  ;;  %2964 = vmatpush3.bf16.msra.mxu1 %v3099_v24 }
 0x730   : > { %v1815_v57 = vpack.c.bf16 %v1803_v54, %v1802_v53 }
 0x731   : > { %v1814_v58 = vpack.c.bf16 %v1801_v56, %v1800_v55  ;;  %v2879_v59 = vpop.f32.mrb[56].mxu1  ;;  %2920 = vmatpush3.bf16.msra.mxu0 %v3093_v25  ;;  %v2465_v25 = vld [vmem:[%s3529_s3 + $0x8] ss:$0 sm:$0xff] }
 0x732   : > { %v1774_v60 = vadd.f32 %v2879_v59, %v3381_v30  ;;  %v1765_v61 = vpop.f32.mrb[57].mxu1  ;;  %2921 = vmatprep.subr.bf16.mxu0 %v3094_v26 }
 0x733   : > { %v1766_v62 = vadd.f32 %v3381_v30, %v1765_v61  ;;  %v2880_v63 = vpop.f32.mrb[58].mxu1  ;;  %2905 = vmatprep.mubr.bf16.mxu0 %v1814_v58 }
 0x734   : > { %v1777_v0 = vadd.f32 %v2880_v63, %v3381_v30  ;;  %v1768_v1 = vpop.f32.mrb[59].mxu1  ;;  %2906 = vmatmul.mubr.bf16.gmra.mrb[68].mxu0 %v1815_v57  ;;  %v1806_v3 = vmax.f32 %v1774_v60, 0.0 }
 0x735   : > { %v1769_v2 = vadd.f32 %v3381_v30, %v1768_v1  ;;  %2922 = vmatpush3.bf16.msra.mxu0 %v3094_v26  ;;  %v1804_v5 = vmax.f32 %v1766_v62, 0.0 }
 0x736   : > { %v1807_v4 = vmax.f32 %v1777_v0, 0.0  ;;  %2923 = vmatprep.subr.bf16.mxu0 %v3366_v27 }
 0x737   : > { %v1805_v6 = vmax.f32 %v1769_v2, 0.0 }
 0x738   : > { %v1817_v7 = vpack.c.bf16 %v1807_v4, %v1806_v3 }
 0x739   : > { %v1816_v8 = vpack.c.bf16 %v1805_v6, %v1804_v5  ;;  %v2883_v9 = vpop.f32.mrb[60].mxu1  ;;  %2924 = vmatpush3.bf16.msra.mxu0 %v3366_v27 }
 0x73a   : > { %v1790_v10 = vadd.f32 %v2883_v9, %v3381_v30  ;;  %v1781_v11 = vpop.f32.mrb[61].mxu1  ;;  %2925 = vmatprep.subr.bf16.mxu0 %v3369_v28 }
 0x73b   : > { %v1782_v12 = vadd.f32 %v3381_v30, %v1781_v11  ;;  %v2884_v13 = vpop.f32.mrb[62].mxu1  ;;  %2909 = vmatprep.mubr.bf16.mxu0 %v1816_v8 }
 0x73c   : > { %v1793_v14 = vadd.f32 %v2884_v13, %v3381_v30  ;;  %v1784_v15 = vpop.f32.mrb[63].mxu1  ;;  %2910 = vmatmul.mubr.bf16.gmra.mrb[72].mxu0 %v1817_v7  ;;  %v1810_v17 = vmax.f32 %v1790_v10, 0.0 }
 0x73d   : > { %v1785_v16 = vadd.f32 %v3381_v30, %v1784_v15  ;;  %2926 = vmatpush3.bf16.msra.mxu0 %v3369_v28  ;;  %v1808_v19 = vmax.f32 %v1782_v12, 0.0 }
 0x73e   : > { %v1811_v18 = vmax.f32 %v1793_v14, 0.0  ;;  %2927 = vmatprep.subr.bf16.mxu0 %v3373_v29 }
 0x73f   : > { %v1809_v20 = vmax.f32 %v1785_v16, 0.0 }
 0x740   : > { %v1819_v21 = vpack.c.bf16 %v1811_v18, %v1810_v17  ;;  %v2196_v18 = vlaneseq }
 0x741   : > { %v1818_v22 = vpack.c.bf16 %v1809_v20, %v1808_v19  ;;  %2928 = vmatpush3.bf16.msra.mxu0 %v3373_v29  ;;  %v2194_v20 = vld [vmem:[%s3530_s4] sm:$0x1] }
 0x742   : > { %2929 = vmatprep.subr.bf16.mxu0 %v3098_v23  ;;  %v2197_v19 = vshrl.u32 %v2196_v18, 7 }
 0x743   : > { %2913 = vmatprep.mubr.bf16.mxu0 %v1818_v22 }
 0x744   : > { %2914 = vmatmul.mubr.bf16.gmra.mrb[76].mxu0 %v1819_v21  ;;  %v2195_v21 = vunpack.c.l.bf16 %v2194_v20  ;;  %v2198_v22 = vsub.s32 0, %v2197_v19 }
 0x745   : > { %2930 = vmatpush3.bf16.msra.mxu0 %v3098_v23  ;;  %v3414_v23 = vld [vmem:[%s3529_s3 + $0x9] ss:$0 sm:$0xff] }
 0x746   : > { %2931 = vmatprep.subr.bf16.mxu0 %v3099_v24 }
 0x749   : > { %2932 = vmatpush3.bf16.msra.mxu0 %v3099_v24 }
 0x7ff   : > { %v2903_v26 = vpop.f32.mrb[64].mxu0 }
 0x800   : > { %v1933_v27 = vadd.f32 %v2903_v26, %v2465_v25  ;;  %v1924_v28 = vpop.f32.mrb[65].mxu0 }
 0x801   : > { %v1925_v29 = vadd.f32 %v2465_v25, %v1924_v28  ;;  %v2904_v30 = vpop.f32.mrb[66].mxu0 }
 0x802   : > { %v1936_v31 = vadd.f32 %v2904_v30, %v2465_v25  ;;  %v1927_v32 = vpop.f32.mrb[67].mxu0  ;;  %v1989_v34 = vmax.f32 %v1933_v27, 0.0  ;;  %v3417_v27 = vrot.slane %v2195_v21, %v2198_v22 }
 0x803   : > { %v1928_v33 = vadd.f32 %v2465_v25, %v1927_v32  ;;  %v1987_v36 = vmax.f32 %v1925_v29, 0.0 }
 0x804   : > { %v1990_v35 = vmax.f32 %v1936_v31, 0.0 }
 0x805   : > { %v1988_v37 = vmax.f32 %v1928_v33, 0.0 }
 0x806   : > { %v2004_v38 = vpack.c.bf16 %v1990_v35, %v1989_v34 }
 0x807   : > { %v2003_v39 = vpack.c.bf16 %v1988_v37, %v1987_v36  ;;  %v2907_v40 = vpop.f32.mrb[68].mxu0 }
 0x808   : > { %v1949_v41 = vadd.f32 %v2907_v40, %v2465_v25  ;;  %v1940_v42 = vpop.f32.mrb[69].mxu0 }
 0x809   : > { %v1941_v43 = vadd.f32 %v2465_v25, %v1940_v42  ;;  %v2908_v44 = vpop.f32.mrb[70].mxu0  ;;  %2933 = vmatprep.mubr.bf16.mxu0 %v2003_v39 }
 0x80a   : > { %v1952_v45 = vadd.f32 %v2908_v44, %v2465_v25  ;;  %v1943_v46 = vpop.f32.mrb[71].mxu0  ;;  %2934 = vmatmul.mubr.bf16.vlgmr.msra.gmra.mrb[80].mxu0 %v2004_v38  ;;  %v1993_v48 = vmax.f32 %v1949_v41, 0.0 }
 0x80b   : > { %v1944_v47 = vadd.f32 %v2465_v25, %v1943_v46  ;;  %v1991_v50 = vmax.f32 %v1941_v43, 0.0 }
 0x80c   : > { %v1994_v49 = vmax.f32 %v1952_v45, 0.0 }
 0x80d   : > { %v1992_v51 = vmax.f32 %v1944_v47, 0.0 }
 0x80e   : > { %v2006_v52 = vpack.c.bf16 %v1994_v49, %v1993_v48 }
 0x80f   : > { %v2005_v53 = vpack.c.bf16 %v1992_v51, %v1991_v50  ;;  %v2911_v54 = vpop.f32.mrb[72].mxu0 }
 0x810   : > { %v1965_v55 = vadd.f32 %v2911_v54, %v2465_v25  ;;  %v1956_v56 = vpop.f32.mrb[73].mxu0 }
 0x811   : > { %v1957_v57 = vadd.f32 %v2465_v25, %v1956_v56  ;;  %v2912_v58 = vpop.f32.mrb[74].mxu0  ;;  %2937 = vmatprep.mubr.bf16.mxu1 %v2005_v53 }
 0x812   : > { %v1968_v59 = vadd.f32 %v2912_v58, %v2465_v25  ;;  %v1959_v60 = vpop.f32.mrb[75].mxu0  ;;  %2938 = vmatmul.mubr.bf16.vlgmr.msra.gmra.mrb[64].mxu1 %v2006_v52  ;;  %v1997_v62 = vmax.f32 %v1965_v55, 0.0 }
 0x813   : > { %v1960_v61 = vadd.f32 %v2465_v25, %v1959_v60  ;;  %v1995_v0 = vmax.f32 %v1957_v57, 0.0 }
 0x814   : > { %v1998_v63 = vmax.f32 %v1968_v59, 0.0 }
 0x815   : > { %v1996_v1 = vmax.f32 %v1960_v61, 0.0 }
 0x816   : > { %v2008_v2 = vpack.c.bf16 %v1998_v63, %v1997_v62 }
 0x817   : > { %v2007_v3 = vpack.c.bf16 %v1996_v1, %v1995_v0  ;;  %v2915_v4 = vpop.f32.mrb[76].mxu0 }
 0x818   : > { %v1981_v5 = vadd.f32 %v2915_v4, %v2465_v25  ;;  %v1972_v6 = vpop.f32.mrb[77].mxu0 }
 0x819   : > { %v1973_v7 = vadd.f32 %v2465_v25, %v1972_v6  ;;  %v2916_v8 = vpop.f32.mrb[78].mxu0  ;;  %2941 = vmatprep.mubr.bf16.mxu1 %v2007_v3 }
 0x81a   : > { %v1984_v9 = vadd.f32 %v2916_v8, %v2465_v25  ;;  %v1975_v10 = vpop.f32.mrb[79].mxu0  ;;  %2942 = vmatmul.mubr.bf16.gmra.mrb[68].mxu1 %v2008_v2  ;;  %v2001_v12 = vmax.f32 %v1981_v5, 0.0 }
 0x81b   : > { %v1976_v11 = vadd.f32 %v2465_v25, %v1975_v10  ;;  %v1999_v14 = vmax.f32 %v1973_v7, 0.0 }
 0x81c   : > { %v2002_v13 = vmax.f32 %v1984_v9, 0.0 }
 0x81d   : > { %v2000_v15 = vmax.f32 %v1976_v11, 0.0 }
 0x81e   : > { %v2010_v16 = vpack.c.bf16 %v2002_v13, %v2001_v12 }
 0x81f   : > { %v2009_v17 = vpack.c.bf16 %v2000_v15, %v1999_v14 }
 0x821   : > { %2945 = vmatprep.mubr.bf16.mxu1 %v2009_v17 }
 0x822   : > { %2946 = vmatmul.mubr.bf16.gmra.mrb[72].mxu1 %v2010_v16 }
 0x8dd   : > { %v2935_v24 = vpop.f32.mrb[80].mxu0 }
 0x8de   : > { %v2124_v25 = vadd.f32 %v2935_v24, %v3414_v23  ;;  %v2115_v26 = vpop.f32.mrb[81].mxu0 }
 0x8df   : > { %v2116_v28 = vadd.f32 %v3414_v23, %v2115_v26  ;;  %v2936_v29 = vpop.f32.mrb[82].mxu0 }
 0x8e0   : > { %v2180_v30 = vmax.f32 %v2124_v25, 0.0  ;;  %v2127_v31 = vadd.f32 %v2936_v29, %v3414_v23  ;;  %v2118_v32 = vpop.f32.mrb[83].mxu0 }
 0x8e1   : > { %v2178_v33 = vmax.f32 %v2116_v28, 0.0  ;;  %v2119_v34 = vadd.f32 %v3414_v23, %v2118_v32 }
 0x8e2   : > { %v2181_v35 = vmax.f32 %v2127_v31, 0.0  ;;  %v2202_v36 = vmul.f32 %v3417_v27, %v2180_v30 }
 0x8e3   : > { %v2179_v37 = vmax.f32 %v2119_v34, 0.0  ;;  %v2200_v38 = vmul.f32 %v3417_v27, %v2178_v33 }
 0x8e4   : > { %2220 = vadd.xlane.f32.xlu1 %v2202_v36  ;;  %v2203_v42 = vmul.f32 %v3417_v27, %v2181_v35 }
 0x8e5   : > { %v2939_v39 = vpop.f32.mrb[64].mxu1  ;;  %2216 = vadd.xlane.f32.xlu0 %v2200_v38  ;;  %v2201_v45 = vmul.f32 %v3417_v27, %v2179_v37 }
 0x8e6   : > { %v2140_v40 = vadd.f32 %v2939_v39, %v3414_v23  ;;  %v2131_v41 = vpop.f32.mrb[65].mxu1 }
 0x8e7   : > { %v2132_v43 = vadd.f32 %v3414_v23, %v2131_v41  ;;  %v2940_v44 = vpop.f32.mrb[66].mxu1 }
 0x8e8   : > { %v2184_v46 = vmax.f32 %v2140_v40, 0.0  ;;  %v2143_v47 = vadd.f32 %v2940_v44, %v3414_v23  ;;  %v2134_v48 = vpop.f32.mrb[67].mxu1  ;;  %2222 = vadd.xlane.f32.xlu1 %v2203_v42 }
 0x8e9   : > { %v2135_v49 = vadd.f32 %v3414_v23, %v2134_v48  ;;  %2218 = vadd.xlane.f32.xlu0 %v2201_v45  ;;  %v2182_v52 = vmax.f32 %v2132_v43, 0.0 }
 0x8ea   : > { %v2185_v50 = vmax.f32 %v2143_v47, 0.0  ;;  %v2206_v51 = vmul.f32 %v3417_v27, %v2184_v46 }
 0x8eb   : > { %v2183_v53 = vmax.f32 %v2135_v49, 0.0  ;;  %v2204_v60 = vmul.f32 %v3417_v27, %v2182_v52 }
 0x8ec   : > { %v2207_v54 = vmul.f32 %v3417_v27, %v2185_v50 }
 0x8ed   : > { %v2943_v55 = vpop.f32.mrb[68].mxu1  ;;  %2228 = vadd.xlane.f32.xlu0 %v2206_v51  ;;  %v2205_v0 = vmul.f32 %v3417_v27, %v2183_v53 }
 0x8ee   : > { %v2156_v56 = vadd.f32 %v2943_v55, %v3414_v23  ;;  %v2147_v57 = vpop.f32.mrb[69].mxu1  ;;  %2230 = vadd.xlane.f32.xlu1 %v2207_v54 }
 0x8ef   : > { %v2148_v58 = vadd.f32 %v3414_v23, %v2147_v57  ;;  %v2944_v59 = vpop.f32.mrb[70].mxu1 }
 0x8f0   : > { %v2188_v61 = vmax.f32 %v2156_v56, 0.0  ;;  %v2159_v62 = vadd.f32 %v2944_v59, %v3414_v23  ;;  %v2150_v63 = vpop.f32.mrb[71].mxu1 }
 0x8f1   : > { %v2151_v1 = vadd.f32 %v3414_v23, %v2150_v63  ;;  %2224 = vadd.xlane.f32.xlu0 %v2204_v60  ;;  %v2186_v4 = vmax.f32 %v2148_v58, 0.0 }
 0x8f2   : > { %v2189_v2 = vmax.f32 %v2159_v62, 0.0  ;;  %2226 = vadd.xlane.f32.xlu1 %v2205_v0  ;;  %v2210_v3 = vmul.f32 %v3417_v27, %v2188_v61 }
 0x8f3   : > { %v2187_v5 = vmax.f32 %v2151_v1, 0.0  ;;  %v2208_v12 = vmul.f32 %v3417_v27, %v2186_v4 }
 0x8f4   : > { %v2211_v6 = vmul.f32 %v3417_v27, %v2189_v2 }
 0x8f5   : > { %v2947_v7 = vpop.f32.mrb[72].mxu1  ;;  %2236 = vadd.xlane.f32.xlu0 %v2210_v3  ;;  %v2209_v14 = vmul.f32 %v3417_v27, %v2187_v5 }
 0x8f6   : > { %v2163_v8 = vpop.f32.mrb[73].mxu1  ;;  %2238 = vadd.xlane.f32.xlu1 %v2211_v6  ;;  %v2172_v9 = vadd.f32 %v2947_v7, %v3414_v23 }
 0x8f7   : > { %v2164_v10 = vadd.f32 %v3414_v23, %v2163_v8  ;;  %v2948_v11 = vpop.f32.mrb[74].mxu1 }
 0x8f8   : > { %v2166_v13 = vpop.f32.mrb[75].mxu1  ;;  %v2175_v16 = vadd.f32 %v2948_v11, %v3414_v23  ;;  %v2192_v18 = vmax.f32 %v2172_v9, 0.0 }
 0x8f9   : > { %v2190_v15 = vmax.f32 %v2164_v10, 0.0  ;;  %v2167_v17 = vadd.f32 %v3414_v23, %v2166_v13  ;;  %2232 = vadd.xlane.f32.xlu0 %v2208_v12  ;;  %v2483_v23 = vld [vmem:[%s3531_s5] ss:$0 sm:$0xff] }
 0x8fa   : > { %2234 = vadd.xlane.f32.xlu1 %v2209_v14  ;;  %v2193_v21 = vmax.f32 %v2175_v16, 0.0  ;;  %v2214_v24 = vmul.f32 %v3417_v27, %v2192_v18 }
 0x8fb   : > { %v2191_v19 = vmax.f32 %v2167_v17, 0.0  ;;  %v2212_v20 = vmul.f32 %v3417_v27, %v2190_v15 }
 0x8fc   : > { %v2215_v25 = vmul.f32 %v3417_v27, %v2193_v21 }
 0x8fd   : > { %2240 = vadd.xlane.f32.xlu0 %v2212_v20  ;;  %v2213_v22 = vmul.f32 %v3417_v27, %v2191_v19 }
 0x8ff   : > { %2242 = vadd.xlane.f32.xlu1 %v2213_v22 }
 0x901   : > { %2244 = vadd.xlane.f32.xlu0 %v2214_v24 }
 0x903   : > { %2246 = vadd.xlane.f32.xlu1 %v2215_v25 }
 0x971   : > { %v2221_v26 = vpop.xlane.xlu1 %2220 }
 0x972   : > { %v2257_v28 = vadd.f32 %v2483_v23, %v2221_v26  ;;  %v2217_v29 = vpop.xlane.xlu0 %2216 }
 0x973   : > { %v2255_v30 = vadd.f32 %v2483_v23, %v2217_v29 }
 0x974   : > { %2273 = vst [vmem:[%s3456_s12 + $0x10] sm:$0xff] %v2257_v28 }
 0x975   : > { %2271 = vst [vmem:[%s3456_s12] sm:$0xff] %v2255_v30  ;;  %v2223_v27 = vpop.xlane.xlu1 %2222 }
 0x976   : > { %v2258_v31 = vadd.f32 %v2483_v23, %v2223_v27  ;;  %v2219_v32 = vpop.xlane.xlu0 %2218 }
 0x977   : > { %v2256_v33 = vadd.f32 %v2483_v23, %v2219_v32 }
 0x978   : > { %2274 = vst [vmem:[%s3456_s12 + $0x18] sm:$0xff] %v2258_v31 }
 0x979   : > { %2272 = vst [vmem:[%s3456_s12 + $0x8] sm:$0xff] %v2256_v33 }
 0x97a   : > { %v2229_v34 = vpop.xlane.xlu0 %2228 }
 0x97b   : > { %v2261_v35 = vadd.f32 %v2483_v23, %v2229_v34  ;;  %v2231_v36 = vpop.xlane.xlu1 %2230 }
 0x97c   : > { %v2262_v37 = vadd.f32 %v2483_v23, %v2231_v36 }
 0x97d   : > { %2277 = vst [vmem:[%s3456_s12 + $0x30] sm:$0xff] %v2261_v35 }
 0x97e   : > { %2278 = vst [vmem:[%s3456_s12 + $0x38] sm:$0xff] %v2262_v37  ;;  %v2225_v38 = vpop.xlane.xlu0 %2224 }
 0x97f   : > { %v2259_v39 = vadd.f32 %v2483_v23, %v2225_v38  ;;  %v2227_v40 = vpop.xlane.xlu1 %2226 }
 0x980   : > { %v2260_v41 = vadd.f32 %v2483_v23, %v2227_v40 }
 0x981   : > { %2275 = vst [vmem:[%s3456_s12 + $0x20] sm:$0xff] %v2259_v39 }
 0x982   : > { %2276 = vst [vmem:[%s3456_s12 + $0x28] sm:$0xff] %v2260_v41  ;;  %v2237_v42 = vpop.xlane.xlu0 %2236 }
 0x983   : > { %v2265_v43 = vadd.f32 %v2483_v23, %v2237_v42  ;;  %v2239_v44 = vpop.xlane.xlu1 %2238 }
 0x984   : > { %v2266_v45 = vadd.f32 %v2483_v23, %v2239_v44 }
 0x985   : > { %2281 = vst [vmem:[%s3456_s12 + $0x50] sm:$0xff] %v2265_v43 }
 0x986   : > { %2282 = vst [vmem:[%s3456_s12 + $0x58] sm:$0xff] %v2266_v45  ;;  %v2233_v46 = vpop.xlane.xlu0 %2232 }
 0x987   : > { %v2263_v47 = vadd.f32 %v2483_v23, %v2233_v46  ;;  %v2235_v48 = vpop.xlane.xlu1 %2234 }
 0x988   : > { %v2264_v49 = vadd.f32 %v2483_v23, %v2235_v48 }
 0x989   : > { %2279 = vst [vmem:[%s3456_s12 + $0x40] sm:$0xff] %v2263_v47 }
 0x98a   : > { %2280 = vst [vmem:[%s3456_s12 + $0x48] sm:$0xff] %v2264_v49  ;;  %v2241_v50 = vpop.xlane.xlu0 %2240 }
 0x98b   : > { %v2267_v51 = vadd.f32 %v2483_v23, %v2241_v50 }
 0x98c   : > { %v2243_v52 = vpop.xlane.xlu1 %2242 }
 0x98d   : > { %2283 = vst [vmem:[%s3456_s12 + $0x60] sm:$0xff] %v2267_v51  ;;  %v2268_v53 = vadd.f32 %v2483_v23, %v2243_v52 }
 0x98e   : > { %v2245_v54 = vpop.xlane.xlu0 %2244 }
 0x98f   : > { %2284 = vst [vmem:[%s3456_s12 + $0x68] sm:$0xff] %v2268_v53  ;;  %v2269_v55 = vadd.f32 %v2483_v23, %v2245_v54 }
 0x990   : > { %v2247_v56 = vpop.xlane.xlu1 %2246 }
 0x991   : > { %2285 = vst [vmem:[%s3456_s12 + $0x70] sm:$0xff] %v2269_v55  ;;  %v2270_v57 = vadd.f32 %v2483_v23, %v2247_v56 }
 0x993   : > { %2286 = vst [vmem:[%s3456_s12 + $0x78] sm:$0xff] %v2270_v57 }
 0x994   : > { %3141 = shalt.err (!%p3138_p7)
}
 0x995   : > { %s3142_s29 = scalar_lea.hbm %s3477_s18, 2048  ;;  %s3146_s14 = scalar_lea.hbm %s3532_s6, 4096 }
 0x996   : > { %p3143_p8 = scmp.ne.s32.totalorder %s3477_s18, %s3142_s29  ;;  %p3147_p1 = scmp.lt.u32.totalorder %s3477_s18, %s3532_s6 }
 0x997   : > { %p3148_p0 = scmp.lt.u32.totalorder %s3146_s14, %s3142_s29  ;;  %p3150_p6 = scmp.lt.u32.totalorder %s3142_s29, %s3477_s18 }
 0x998   : > { %p3144_p11 = pnand %p3143_p8, %p3543_p9 }
 0x999   : > { %p3149_p5 = por %p3148_p0, %p3147_p1 }
 0x99a   : > { %p3145_p13 = pneg %p3144_p11 }
 0x99b   : > { %p3151_p10 = por %p3150_p6, %p3149_p5 }
 0x99d   : > { %p3152_p12 = pnand %p3151_p10, %p3145_p13 }
 0x99f   : > { %3155 = shalt.err (!%p3152_p12)
}
 0x9a0   : > { %s3200_s16 = smov 128   ;;  %s3201_s17 = smov 8  }
 0x9a1   : > { %2969 = dma.vmem_to_hbm [thread:$0]  (%p3543_p9), %s3479_s11, 2048, %s3477_s18, %s3485_s25, %s3200_s16, %s3200_s16, %s3201_s17  }
 0x9a2 PF: > { %p2981_p2 = scmp.ge.s32.totalorder %s3194_s24, 2  ;;  %s2316_s9 = sand.u32 1, %s3182_s21  }
 0x9a3   : > { %p3544_p3 = scmp.ne.s32.totalorder %s3537_s8, 0  ;;  %s2317_s19 = scalar_lea.sflag [#allocation4], %s2316_s9 }
 0x9a5   : > { %p2976_p4 = pnand %p2981_p2, %p3544_p3 }
 0x9a7   : > { %3177 = dma.done.wait (!%p2976_p4), %s2317_s19, 2048  }
 0x9a8   : > { %3179 = vsyncadd (!%p2976_p4), %s2317_s19, 4294965248  ;;  %p17_p7 = scmp.ge.s32.totalorder %s3262_s27, 4   ;;  %s3545_s21 = smov %s3186_s22 }
 0x9a9   : > { %s3546_s22 = smov %s3190_s23  ;;  %s3547_s23 = smov %s3273_s30 }
 0x9aa   : > { %s3548_s24 = smov %s3262_s27  ;;  %19 = sbr.rel (!%p17_p7) target bundleno = 4 (0x4), region = 92 }
 0x9b1   :  { %2322 = vsyncpa [#allocation3], 1 }
 0x9b2   :  { %2324 = vsyncpa [#allocation3 + $0x1], 1 }
 0x9b3   :  { %2325 = vsyncpa [#allocation4], 1 }
 0x9b4   :  { %2327 = vsyncpa [#allocation4 + $0x1], 1 }

</bundles_post_ra>
